<compile_context>
chip_gen: v7x
topology: tpu7x:2x2x1
jax: 0.10.0
libtpu: 0.0.40
codegen_flags: <defaults>
</compile_context>

<pallas_src>
import math
import functools

import jax
import jax.numpy as jnp
from jax.experimental import pallas as pl
from jax.experimental.pallas import tpu as pltpu


_LANE = 128  # TPU lane width; Cout tile size


def _equal_conv2d_kernel(x_ref, w_ref, b_ref, o_ref, patch_ref, *,
                         K, S, Ho, Wo, Cin):
    """Grid = (batch, Cout tile).

    x_ref:     (1, Hp, Wp, Cin)        padded NHWC input (whole image)
    w_ref:     (K*K*Cin, TC)           scaled, im2col-reshaped weight tile
    b_ref:     (1, TC)                 bias tile (lane-aligned 2-D, f32)
    o_ref:     (1, Ho*Wo, TC)          output tile (lane-dense, TC = 128)
    patch_ref: (Ho*Wo, K*K*Cin) VMEM   im2col patch-matrix scratch
    """
    # Build the im2col patch matrix once per image.  The Cout axis is the
    # fastest grid axis and the scratch persists across grid steps, so taps
    # are extracted/relaid-out once per image, not once per tap-matmul.
    @pl.when(pl.program_id(1) == 0)
    def _build_patches():
        x = x_ref[0]                                      # (Hp, Wp, Cin)
        for kh in range(K):
            for kw in range(K):
                # TODO(synk): for stride > 1, pre-phase-split in the wrapper to
                # keep these slices unit-stride (test config uses stride=1).
                tap = x[kh:kh + (Ho - 1) * S + 1:S,
                        kw:kw + (Wo - 1) * S + 1:S, :]    # (Ho, Wo, Cin)
                c0 = (kh * K + kw) * Cin
                patch_ref[:, c0:c0 + Cin] = tap.reshape(Ho * Wo, Cin)

    # Single MXU matmul: contraction over K*K*Cin, f32 accumulation.
    # (Operands stay in the input dtype; cast inputs to bf16 upstream on
    #  v6e/v7x if model accuracy allows.)
    acc = jnp.dot(patch_ref[...], w_ref[...],
                  preferred_element_type=jnp.float32)     # (Ho*Wo, TC)
    acc = acc + b_ref[...].astype(jnp.float32)
    o_ref[0] = acc.astype(o_ref.dtype)


def equal_conv2d(x_nchw, weight, bias, *, stride=1, padding=0):
    """EqualConv2d forward.

    x_nchw: (N, Cin, H, W)
    weight: (Cout, Cin, K, K)   raw, un-scaled (scale folded in here)
    bias:   (Cout,) or None
    returns (N, Cout, Ho, Wo)
    """
    N, Cin, H, W = x_nchw.shape
    Cout, Cin_w, K, K2 = weight.shape
    assert Cin == Cin_w and K == K2
    S, P = stride, padding
    scale = 1.0 / math.sqrt(Cin * K * K)

    Ho = (H + 2 * P - K) // S + 1
    Wo = (W + 2 * P - K) // S + 1
    Mo = Ho * Wo
    Cout_p = ((Cout + _LANE - 1) // _LANE) * _LANE        # lane-dense Cout
    TC = _LANE
    n_ct = Cout_p // TC

    # ---- wrapper-side glue (fuses into layout copies XLA performs anyway) ----
    x_nhwc = jnp.transpose(x_nchw, (0, 2, 3, 1))                   # (N,H,W,Cin)
    x_pad = jnp.pad(x_nhwc, ((0, 0), (P, P), (P, P), (0, 0)))      # (N,Hp,Wp,Cin)
    Hp, Wp = H + 2 * P, W + 2 * P

    # Equalized-lr scale applied ONCE, folded into the weight transpose+reshape.
    w_im2col = (jnp.transpose(weight, (2, 3, 1, 0)) * scale)       # (K,K,Cin,Cout)
    w_im2col = w_im2col.reshape(K * K * Cin, Cout)
    w_im2col = jnp.pad(w_im2col, ((0, 0), (0, Cout_p - Cout))).astype(x_nchw.dtype)

    if bias is None:
        bias = jnp.zeros((Cout,), jnp.float32)  # TODO(synk): bias=False path folds to zero-add
    b2 = jnp.pad(bias.astype(jnp.float32), (0, Cout_p - Cout)).reshape(1, Cout_p)

    kernel = functools.partial(_equal_conv2d_kernel,
                               K=K, S=S, Ho=Ho, Wo=Wo, Cin=Cin)

    out = pl.pallas_call(
        kernel,
        out_shape=jax.ShapeDtypeStruct((N, Mo, Cout_p), x_nchw.dtype),
        grid_spec=pltpu.PrefetchScalarGridSpec(
            num_scalar_prefetch=0,
            grid=(N, n_ct),
            in_specs=[
                pl.BlockSpec((1, Hp, Wp, Cin), lambda n, c: (n, 0, 0, 0)),
                pl.BlockSpec((K * K * Cin, TC), lambda n, c: (0, c)),
                pl.BlockSpec((1, TC), lambda n, c: (0, c)),
            ],
            out_specs=pl.BlockSpec((1, Mo, TC), lambda n, c: (n, 0, c)),
            scratch_shapes=[pltpu.VMEM((Mo, K * K * Cin), x_nchw.dtype)],
        ),
        compiler_params=pltpu.CompilerParams(
            # batch axis parallel (megacore); Cout axis arbitrary because the
            # im2col scratch is built at c == 0 and reused for later Cout tiles.
            dimension_semantics=("parallel", "arbitrary")),
    )(x_pad, w_im2col, b2)

    out = out[:, :, :Cout].reshape(N, Ho, Wo, Cout)                # drop Cout pad
    return jnp.transpose(out, (0, 3, 1, 2))                        # back to NCHW


if __name__ == "__main__":
    # Small config consistent with EqualConv2d(in=4, out=8, k=3, stride=1, padding=1)
    N, Cin, H, W = 2, 4, 16, 16
    Cout, K = 8, 3
    stride, padding = 1, 1

    key = jax.random.PRNGKey(0)
    kx, kw, kb = jax.random.split(key, 3)
    x = jax.random.normal(kx, (N, Cin, H, W), jnp.float32)
    # nn.Parameter(torch.randn(out, in, k, k)) -> deterministic normal init
    weight = jax.random.normal(kw, (Cout, Cin, K, K), jnp.float32)
    # bias parameter (zeros at init; use small nonzero values to exercise the path)
    bias = 0.1 * jax.random.normal(kb, (Cout,), jnp.float32)

    out = equal_conv2d(x, weight, bias, stride=stride, padding=padding)
    jax.block_until_ready(out)

    # sanity check vs XLA reference conv
    scale = 1.0 / math.sqrt(Cin * K * K)
    ref = jax.lax.conv_general_dilated(
        x, weight * scale,
        window_strides=(stride, stride),
        padding=[(padding, padding), (padding, padding)],
        dimension_numbers=("NCHW", "OIHW", "NCHW"),
    ) + bias[None, :, None, None]
    assert out.shape == (N, Cout, H, W)
    assert jnp.allclose(out, ref, atol=1e-4, rtol=1e-4)

    print("KERNEL_OK")
</pallas_src>

<mosaic_0001>
module attributes {stable_mosaic.version = 11 : i64} {
  func.func @_equal_conv2d_kernel(%arg0: i32, %arg1: i32, %arg2: memref<1x18x18x4xf32, #tpu.memory_space<vmem>>, %arg3: memref<36x128xf32, #tpu.memory_space<vmem>>, %arg4: memref<1x128xf32, #tpu.memory_space<vmem>>, %arg5: memref<1x256x128xf32, #tpu.memory_space<vmem>>, %arg6: memref<256x36xf32, #tpu.memory_space<vmem>>) attributes {dimension_semantics = [#tpu.dimension_semantics<parallel>, #tpu.dimension_semantics<arbitrary>], iteration_bounds = array<i64: 2, 1>, scalar_prefetch = 0 : i64, scratch_operands = 1 : i64, tpu.core_type = #tpu.core_type<tc>, window_params = [{transform_indices = @transform_0, window_bounds = array<i64: 1, 18, 18, 4>}, {transform_indices = @transform_1, window_bounds = array<i64: 36, 128>}, {transform_indices = @transform_2, window_bounds = array<i64: 1, 128>}, {transform_indices = @transform_3, window_bounds = array<i64: 1, 256, 128>}]} {
    %c0_i32 = arith.constant 0 : i32
    %0 = arith.cmpi eq, %arg1, %c0_i32 : i32
    %1 = arith.extui %0 : i1 to i32
    %c0_i32_0 = arith.constant 0 : i32
    %2 = arith.cmpi ne, %1, %c0_i32_0 : i32
    scf.if %2 {
      %c0_9 = arith.constant 0 : index
      %c0_10 = arith.constant 0 : index
      %c0_11 = arith.constant 0 : index
      %c0_12 = arith.constant 0 : index
      %12 = vector.load %arg2[%c0_9, %c0_10, %c0_11, %c0_12] : memref<1x18x18x4xf32, #tpu.memory_space<vmem>>, vector<1x18x18x4xf32>
      %13 = vector.shape_cast %12 : vector<1x18x18x4xf32> to vector<18x18x4xf32>
      %14 = vector.extract_strided_slice %13 {offsets = [0, 0, 0], sizes = [16, 16, 4], strides = [1, 1, 1]} : vector<18x18x4xf32> to vector<16x16x4xf32>
      %15 = vector.shape_cast %14 : vector<16x16x4xf32> to vector<256x4xf32>
      %c0_13 = arith.constant 0 : index
      %c0_14 = arith.constant 0 : index
      %16 = vector.load %arg6[%c0_13, %c0_14] : memref<256x36xf32, #tpu.memory_space<vmem>>, vector<256x4xf32>
      tpu.vector_store %arg6[%c0_13, %c0_14], %15 {strides = array<i32>} : memref<256x36xf32, #tpu.memory_space<vmem>>, vector<256x4xf32>,
      %17 = vector.extract_strided_slice %13 {offsets = [0, 1, 0], sizes = [16, 16, 4], strides = [1, 1, 1]} : vector<18x18x4xf32> to vector<16x16x4xf32>
      %18 = vector.shape_cast %17 : vector<16x16x4xf32> to vector<256x4xf32>
      %c0_15 = arith.constant 0 : index
      %c4 = arith.constant 4 : index
      %19 = vector.load %arg6[%c0_15, %c4] : memref<256x36xf32, #tpu.memory_space<vmem>>, vector<256x4xf32>
      tpu.vector_store %arg6[%c0_15, %c4], %18 {strides = array<i32>} : memref<256x36xf32, #tpu.memory_space<vmem>>, vector<256x4xf32>,
      %20 = vector.extract_strided_slice %13 {offsets = [0, 2, 0], sizes = [16, 16, 4], strides = [1, 1, 1]} : vector<18x18x4xf32> to vector<16x16x4xf32>
      %21 = vector.shape_cast %20 : vector<16x16x4xf32> to vector<256x4xf32>
      %c0_16 = arith.constant 0 : index
      %c8 = arith.constant 8 : index
      %22 = vector.load %arg6[%c0_16, %c8] : memref<256x36xf32, #tpu.memory_space<vmem>>, vector<256x4xf32>
      tpu.vector_store %arg6[%c0_16, %c8], %21 {strides = array<i32>} : memref<256x36xf32, #tpu.memory_space<vmem>>, vector<256x4xf32>,
      %23 = vector.extract_strided_slice %13 {offsets = [1, 0, 0], sizes = [16, 16, 4], strides = [1, 1, 1]} : vector<18x18x4xf32> to vector<16x16x4xf32>
      %24 = vector.shape_cast %23 : vector<16x16x4xf32> to vector<256x4xf32>
      %c0_17 = arith.constant 0 : index
      %c12 = arith.constant 12 : index
      %25 = vector.load %arg6[%c0_17, %c12] : memref<256x36xf32, #tpu.memory_space<vmem>>, vector<256x4xf32>
      tpu.vector_store %arg6[%c0_17, %c12], %24 {strides = array<i32>} : memref<256x36xf32, #tpu.memory_space<vmem>>, vector<256x4xf32>,
      %26 = vector.extract_strided_slice %13 {offsets = [1, 1, 0], sizes = [16, 16, 4], strides = [1, 1, 1]} : vector<18x18x4xf32> to vector<16x16x4xf32>
      %27 = vector.shape_cast %26 : vector<16x16x4xf32> to vector<256x4xf32>
      %c0_18 = arith.constant 0 : index
      %c16 = arith.constant 16 : index
      %28 = vector.load %arg6[%c0_18, %c16] : memref<256x36xf32, #tpu.memory_space<vmem>>, vector<256x4xf32>
      tpu.vector_store %arg6[%c0_18, %c16], %27 {strides = array<i32>} : memref<256x36xf32, #tpu.memory_space<vmem>>, vector<256x4xf32>,
      %29 = vector.extract_strided_slice %13 {offsets = [1, 2, 0], sizes = [16, 16, 4], strides = [1, 1, 1]} : vector<18x18x4xf32> to vector<16x16x4xf32>
      %30 = vector.shape_cast %29 : vector<16x16x4xf32> to vector<256x4xf32>
      %c0_19 = arith.constant 0 : index
      %c20 = arith.constant 20 : index
      %31 = vector.load %arg6[%c0_19, %c20] : memref<256x36xf32, #tpu.memory_space<vmem>>, vector<256x4xf32>
      tpu.vector_store %arg6[%c0_19, %c20], %30 {strides = array<i32>} : memref<256x36xf32, #tpu.memory_space<vmem>>, vector<256x4xf32>,
      %32 = vector.extract_strided_slice %13 {offsets = [2, 0, 0], sizes = [16, 16, 4], strides = [1, 1, 1]} : vector<18x18x4xf32> to vector<16x16x4xf32>
      %33 = vector.shape_cast %32 : vector<16x16x4xf32> to vector<256x4xf32>
      %c0_20 = arith.constant 0 : index
      %c24 = arith.constant 24 : index
      %34 = vector.load %arg6[%c0_20, %c24] : memref<256x36xf32, #tpu.memory_space<vmem>>, vector<256x4xf32>
      tpu.vector_store %arg6[%c0_20, %c24], %33 {strides = array<i32>} : memref<256x36xf32, #tpu.memory_space<vmem>>, vector<256x4xf32>,
      %35 = vector.extract_strided_slice %13 {offsets = [2, 1, 0], sizes = [16, 16, 4], strides = [1, 1, 1]} : vector<18x18x4xf32> to vector<16x16x4xf32>
      %36 = vector.shape_cast %35 : vector<16x16x4xf32> to vector<256x4xf32>
      %c0_21 = arith.constant 0 : index
      %c28 = arith.constant 28 : index
      %37 = vector.load %arg6[%c0_21, %c28] : memref<256x36xf32, #tpu.memory_space<vmem>>, vector<256x4xf32>
      tpu.vector_store %arg6[%c0_21, %c28], %36 {strides = array<i32>} : memref<256x36xf32, #tpu.memory_space<vmem>>, vector<256x4xf32>,
      %38 = vector.extract_strided_slice %13 {offsets = [2, 2, 0], sizes = [16, 16, 4], strides = [1, 1, 1]} : vector<18x18x4xf32> to vector<16x16x4xf32>
      %39 = vector.shape_cast %38 : vector<16x16x4xf32> to vector<256x4xf32>
      %c0_22 = arith.constant 0 : index
      %c32 = arith.constant 32 : index
      %40 = vector.load %arg6[%c0_22, %c32] : memref<256x36xf32, #tpu.memory_space<vmem>>, vector<256x4xf32>
      tpu.vector_store %arg6[%c0_22, %c32], %39 {strides = array<i32>} : memref<256x36xf32, #tpu.memory_space<vmem>>, vector<256x4xf32>,
    } else {
    }
    %c0 = arith.constant 0 : index
    %c0_1 = arith.constant 0 : index
    %3 = vector.load %arg6[%c0, %c0_1] : memref<256x36xf32, #tpu.memory_space<vmem>>, vector<256x36xf32>
    %c0_2 = arith.constant 0 : index
    %c0_3 = arith.constant 0 : index
    %4 = vector.load %arg3[%c0_2, %c0_3] : memref<36x128xf32, #tpu.memory_space<vmem>>, vector<36x128xf32>
    %cst = arith.constant dense<0.000000e+00> : vector<256x128xf32>
    %5 = tpu.matmul %3, %4, %cst {dimension_numbers = #tpu.dot_dimension_numbers<[1], [0], [0], [1], [0, 0, 1, 1], [], []>} : vector<256x36xf32>, vector<36x128xf32>, vector<256x128xf32> -> vector<256x128xf32>
    %c0_4 = arith.constant 0 : index
    %c0_5 = arith.constant 0 : index
    %6 = vector.load %arg4[%c0_4, %c0_5] : memref<1x128xf32, #tpu.memory_space<vmem>>, vector<1x128xf32>
    %7 = vector.broadcast %6 : vector<1x128xf32> to vector<256x128xf32>
    %8 = arith.addf %5, %7 : vector<256x128xf32>
    %c0_6 = arith.constant 0 : index
    %c0_7 = arith.constant 0 : index
    %c0_8 = arith.constant 0 : index
    %9 = vector.load %arg5[%c0_6, %c0_7, %c0_8] : memref<1x256x128xf32, #tpu.memory_space<vmem>>, vector<1x256x128xf32>
    %10 = vector.shape_cast %9 : vector<1x256x128xf32> to vector<256x128xf32>
    %11 = vector.shape_cast %8 : vector<256x128xf32> to vector<1x256x128xf32>
    tpu.vector_store %arg5[%c0_6, %c0_7, %c0_8], %11 {strides = array<i32>} : memref<1x256x128xf32, #tpu.memory_space<vmem>>, vector<1x256x128xf32>,
    return
  }
  func.func @transform_0(%arg0: i32, %arg1: i32) -> (i32, i32, i32, i32) {
    %c0_i32 = arith.constant 0 : i32
    %c0_i32_0 = arith.constant 0 : i32
    %c0_i32_1 = arith.constant 0 : i32
    %c0_i32_2 = arith.constant 0 : i32
    return %arg0, %c0_i32, %c0_i32_0, %c0_i32_1 : i32, i32, i32, i32
  }
  func.func @transform_1(%arg0: i32, %arg1: i32) -> (i32, i32) {
    %c0_i32 = arith.constant 0 : i32
    %c0_i32_0 = arith.constant 0 : i32
    return %c0_i32, %arg1 : i32, i32
  }
  func.func @transform_2(%arg0: i32, %arg1: i32) -> (i32, i32) {
    %c0_i32 = arith.constant 0 : i32
    %c0_i32_0 = arith.constant 0 : i32
    return %c0_i32, %arg1 : i32, i32
  }
  func.func @transform_3(%arg0: i32, %arg1: i32) -> (i32, i32, i32) {
    %c0_i32 = arith.constant 0 : i32
    %c0_i32_0 = arith.constant 0 : i32
    return %arg0, %c0_i32, %arg1 : i32, i32, i32
  }
}

</mosaic_0001>

<bundles_post_ra>
// kernel: tpu_custom_call.1
= control target key start
LH: loop header
LB: loop body
LE: loop exit
PB: predicated region body
PF: predicated region fallthrough
CT: control target
= control target key end

     0   :  { %8 = vsyncpa [#allocation4], 0  ;;  %s3923_s0 = inlined_call_operand.vmem [shape: f32[2,18,18,4], index: 0, kind: input, shape index: {}]   ;;  %s3924_s1 = inlined_call_operand.vmem [shape: f32[36,128], index: 1, kind: input, shape index: {}]   ;;  %s3925_s2 = inlined_call_operand.vmem [shape: f32[1,128], index: 2, kind: input, shape index: {}]   ;;  %s3926_s3 = inlined_call_operand.hbm [shape: f32[2,256,128], index: 3, kind: output, shape index: {}]  }
   0x1   :  { %10 = vsyncpa [#allocation4 + $0x1], 0  ;;  %s2422_s12 = smov 0   ;;  %s2424_s13 = smov 0  }
   0x2   :  { %s2426_s14 = smov 0   ;;  %s2428_s15 = smov 0  }
   0x3   :  { %s2430_s16 = smov 0   ;;  %s2432_s17 = smov 0  }
   0x4 LB: > { %s2089_s18 = sadd.s32 4294967295, %s2390_s17   ;;  %s2090_s19 = sadd.s32 4294967294, %s2390_s17   ;;  %s2390_s17 = sphi %s2432_s17, %s16_s17   ;;  %s2386_s16 = sphi %s2430_s16, %s4065_s16   ;;  %s2382_s15 = sphi %s2428_s15, %s4064_s15   ;;  %s2378_s14 = sphi %s2426_s14, %s4063_s14   ;;  %s2374_s13 = sphi %s2424_s13, %s4062_s13   ;;  %s2370_s12 = sphi %s2422_s12, %s4061_s12  }
   0x5   : > { %s28_s20 = sadd.s32 1, %s2386_s16  ;;  %s115_s21 = sadd.s32 1, %s2378_s14 }
   0x6   : > { %p30_p0 = scmp.ge.s32.totalorder %s28_s20, 2  ;;  %p125_p1 = scmp.ne.s32.totalorder %s2378_s14, %s2374_s13 }
   0x7   : > { %p126_p2 = scmp.eq.s32.totalorder %s2089_s18, 1  ;;  %p131_p3 = scmp.ne.s32.totalorder %s2374_s13, %s2370_s12 }
   0x8   : > { %s4067_s20 = smov (%p30_p0, %s28_s20), 0  ;;  %p132_p5 = scmp.eq.s32.totalorder %s2090_s19, 1 }
   0x9   : > { %p2462_p4 = por %p126_p2, %p125_p1  ;;  %s110_s23 = ssub.s32 %s2386_s16, %s4067_s20 }
   0xa   : > { %p2095_p6 = scmp.ge.s32.totalorder %s2390_s17, 1  ;;  %p113_p7 = scmp.eq.s32.totalorder %s110_s23, 0 }
   0xb   : > { %p2469_p8 = por %p132_p5, %p131_p3  ;;  %p171_p9 = scmp.lt.s32.totalorder %s2390_s17, 3 }
   0xc   : > { %s2475_s25 = scalar_select %p113_p7, %s2378_s14, %s115_s21  }
   0xd   : > { %p172_p10 = pnand %p2095_p6, %p171_p9 }
   0xf   : > { %175 = sbr.rel (%p172_p10) target bundleno = 895 (0x37f), region = 32 }
  0x16   : > { %p202_p11 = scmp.lt.s32.totalorder %s2382_s15, 1  ;;  %vm272_vm0 = vcmask 31744   ;;  %vm353_vm1 = vcmask 1046528   ;;  %s2392_s4 = smov 4   ;;  %vm563_vm2 = vcmask 1045504   ;;  %vm530_vm3 = vcmask 64544  }
  0x17   : > { %s2393_s5 = smov 8   ;;  %s2394_s6 = smov 12   ;;  %vm740_vm4 = vcmask 97344   ;;  %vm1714_vm5 = vcmask 1043456   ;;  %vm871_vm6 = vcmask 130144   ;;  %vm1006_vm7 = vcmask 162944  }
  0x18   : > { %s203_s26 = scalar_select %p202_p11, %s2382_s15, 1  ;;  %vm1140_vm8 = vcmask 195744   ;;  %vm1271_vm9 = vcmask 228544   ;;  %vm1406_vm10 = vcmask 261344   ;;  %vm1540_vm11 = vcmask 294144  }
  0x19   : > { %s2395_s7 = smov 16   ;;  %s2396_s8 = smov 20   ;;  %vm1617_vm12 = vcmask 293888  }
  0x1a   : > { %s2247_s27 = smul.u32 432, %s203_s26  ;;  %s2397_s9 = smov 24  }
  0x1b   : > { %s2398_s10 = smov 28   ;;  %s2399_s29 = smov 32  }
  0x1c   : > { %s2482_s30 = scalar_lea.vmem %s3923_s0, %s2247_s27  ;;  %s2137_s11 = sshll.u32 %s2382_s15, 12 }
  0x1d   : > { %v2485_v0 = vld [vmem:[%s2482_s30 + $0x18] sm:$0xff]  ;;  %v2488_v1 = vld [vmem:[%s2482_s30 + $0x20] sm:$0xff]  ;;  %v2496_v5 = vld [vmem:[%s2482_s30 + $0x8] sm:$0xff]  ;;  %s3865_s23 = scalar_lea.hbm %s3926_s3, %s2137_s11  ;;  %s2400_s27 = smov [#allocation3]  }
  0x1e   : > { %v2491_v2 = vld [vmem:[%s2482_s30] sm:$0xff]  ;;  %v359_v3 = vrot.slane %v2485_v0, 1  ;;  %v360_v4 = vrot.slane %v2488_v1, 1  ;;  %v2500_v7 = vld [vmem:[%s2482_s30 + $0x28] sm:$0x3]  ;;  %275 = vst.msk [vmem:[#allocation2 + $0x10] sm:$0xff] %vm272_vm0, %v2485_v0 }
  0x1f   : > { %v354_v6 = vrot.slane %v2491_v2, 1  ;;  %273 = vst.msk [vmem:[#allocation2] sm:$0xff] %vm272_vm0, %v2491_v2  ;;  %276 = vst.msk [vmem:[#allocation2 + $0x18] sm:$0xff] %vm272_vm0, %v2488_v1  ;;  %v355_v8 = vrot.slane %v2496_v5, 1  ;;  %v362_v9 = vrot.slane %v2500_v7, 1  ;;  %v2514_v11 = vld [vmem:[%s2482_s30 + $0x38] sm:$0xff] }
  0x20   : > { %v2511_v10 = vld [vmem:[%s2482_s30 + $0x10] sm:$0x3]  ;;  %274 = vst.msk [vmem:[#allocation2 + $0x8] sm:$0xff] %vm272_vm0, %v2496_v5  ;;  %v2522_v13 = vsel %vm353_vm1, %v359_v3, %v360_v4  ;;  %v2526_v15 = vld [vmem:[%s2482_s30 + $0x40] sm:$0x3]  ;;  %278 = vst.msk [vmem:[#allocation2 + $0x28] sm:$0xff] %vm272_vm0, %v2514_v11 }
  0x21   : > { %v2517_v12 = vld [vmem:[%s2482_s30 + $0x30] sm:$0xff]  ;;  %v357_v14 = vrot.slane %v2511_v10, 1  ;;  %438 = vrot.lane.b32.xlu1 %v2522_v13, %s2392_s4  ;;  %v356_v17 = vsel %vm353_vm1, %v354_v6, %v355_v8  ;;  %v2539_v18 = vld [vmem:[%s2482_s30 + $0x48] sm:$0xff]  ;;  %v2548_v20 = vsel %vm353_vm1, %v360_v4, %v362_v9  ;;  %v365_v21 = vrot.slane %v2514_v11, 1  ;;  %v2553_v23 = vld [vmem:[%s2482_s30 + $0x60] sm:$0xff]  ;;  %s2316_s28 = sshll.u32 %s2400_s27, 4  ;;  %s2317_s28 = int_to_ptr.vmem [resolvable:$false] %s2316_s28 }
  0x22   : > { %v2529_v16 = vld [vmem:[%s2482_s30 + $0x50] sm:$0xff]  ;;  %277 = vst.msk [vmem:[#allocation2 + $0x20] sm:$0xff] %vm272_vm0, %v2517_v12  ;;  %v2542_v19 = vld [vmem:[%s2482_s30 + $0x68] sm:$0xff]  ;;  %434 = vrot.lane.b32.xlu0 %v356_v17, %s2392_s4  ;;  %v367_v22 = vrot.slane %v2526_v15, 1  ;;  %v2556_v24 = vld [vmem:[%s2482_s30 + $0x80] sm:$0xff]  ;;  %v364_v26 = vrot.slane %v2517_v12, 1 }
  0x23   : > { %280 = vst.msk [vmem:[#allocation2 + $0x38] sm:$0xff] %vm272_vm0, %v2529_v16  ;;  %279 = vst.msk [vmem:[#allocation2 + $0x30] sm:$0xff] %vm272_vm0, %v2539_v18  ;;  %v358_v25 = vsel %vm353_vm1, %v355_v8, %v357_v14  ;;  %v2565_v27 = vld [vmem:[%s2482_s30 + $0x58] sm:$0x3]  ;;  %v2578_v30 = vld [vmem:[%s2482_s30 + $0x90] sm:$0xff]  ;;  %v370_v34 = vrot.slane %v2529_v16, 1 }
  0x24   : > { %282 = vst.msk [vmem:[#allocation2 + $0x48] sm:$0xff] %vm272_vm0, %v2542_v19  ;;  %v2568_v28 = vld [vmem:[%s2482_s30 + $0x78] sm:$0xff]  ;;  %281 = vst.msk [vmem:[#allocation2 + $0x40] sm:$0xff] %vm272_vm0, %v2553_v23  ;;  %v2585_v31 = vld [vmem:[%s2482_s30 + $0xb0] sm:$0xff]  ;;  %v2596_v33 = vsel %vm353_vm1, %v365_v21, %v367_v22  ;;  %v372_v35 = vrot.slane %v2565_v27, 1  ;;  %v2611_v38 = vsel %vm353_vm1, %v364_v26, %v365_v21  ;;  %v369_v39 = vrot.slane %v2539_v18, 1 }
  0x25   : > { %284 = vst.msk [vmem:[#allocation2 + $0x58] sm:$0xff] %vm272_vm0, %v2556_v24  ;;  %v2575_v29 = vld [vmem:[%s2482_s30 + $0x98] sm:$0xff]  ;;  %283 = vst.msk [vmem:[#allocation2 + $0x50] sm:$0xff] %vm272_vm0, %v2568_v28  ;;  %440 = vrot.lane.b32.xlu1 %v2548_v20, %s2392_s4  ;;  %v2588_v32 = vld [vmem:[%s2482_s30 + $0xa8] sm:$0xff]  ;;  %v375_v48 = vrot.slane %v2542_v19, 1  ;;  %v374_v53 = vrot.slane %v2553_v23, 1 }
  0x26   : > { %285 = vst.msk [vmem:[#allocation2 + $0x60] sm:$0xff] %vm272_vm0, %v2578_v30  ;;  %286 = vst.msk [vmem:[#allocation2 + $0x68] sm:$0xff] %vm272_vm0, %v2575_v29  ;;  %436 = vrot.lane.b32.xlu0 %v358_v25, %s2392_s4  ;;  %v2601_v36 = vld [vmem:[%s2482_s30 + $0x70] sm:$0x3]  ;;  %v2604_v37 = vld [vmem:[%s2482_s30 + $0xc8] sm:$0xff]  ;;  %v2652_v47 = vsel %vm353_vm1, %v370_v34, %v372_v35  ;;  %v2667_v52 = vsel %vm353_vm1, %v369_v39, %v370_v34  ;;  %v380_v60 = vrot.slane %v2556_v24, 1 }
  0x27   : > { %3995 = vst [vmem:[#allocation6_spill] sm:$0xff] %v2596_v33  ;;  %287 = vst.msk [vmem:[#allocation2 + $0x70] sm:$0xff] %vm272_vm0, %v2588_v32  ;;  %v2615_v40 = vld [vmem:[%s2482_s30 + $0xc0] sm:$0xff]  ;;  %v2621_v42 = vld [vmem:[%s2482_s30 + $0xd8] sm:$0xff]  ;;  %v377_v49 = vrot.slane %v2601_v36, 1  ;;  %v2713_v3 = vsel %vm353_vm1, %v374_v53, %v375_v48  ;;  %v379_v4 = vrot.slane %v2568_v28, 1 }
  0x28   : > { %288 = vst.msk [vmem:[#allocation2 + $0x78] sm:$0xff] %vm272_vm0, %v2585_v31  ;;  %v2618_v41 = vld [vmem:[%s2482_s30 + $0xe0] sm:$0xff]  ;;  %290 = vst.msk [vmem:[#allocation2 + $0x88] sm:$0xff] %vm272_vm0, %v2604_v37  ;;  %v2626_v43 = vld [vmem:[%s2482_s30 + $0xf8] sm:$0xff]  ;;  %v385_v9 = vrot.slane %v2575_v29, 1  ;;  %v384_v21 = vrot.slane %v2578_v30, 1 }
  0x29   : > { %v2629_v44 = vld [vmem:[%s2482_s30 + $0xf0] sm:$0xff]  ;;  %289 = vst.msk [vmem:[#allocation2 + $0x80] sm:$0xff] %vm272_vm0, %v2615_v40  ;;  %291 = vst.msk [vmem:[#allocation2 + $0x90] sm:$0xff] %vm272_vm0, %v2621_v42  ;;  %444 = vrot.lane.b32.xlu1 %v2596_v33, %s2392_s4  ;;  %v2643_v46 = vld [vmem:[%s2482_s30 + $0x108] sm:$0xff]  ;;  %v2698_v59 = vsel %vm353_vm1, %v375_v48, %v377_v49  ;;  %v2733_v17 = vsel %vm353_vm1, %v379_v4, %v380_v60  ;;  %v390_v26 = vrot.slane %v2585_v31, 1  ;;  %v389_v39 = vrot.slane %v2588_v32, 1 }
  0x2a   : > { %292 = vst.msk [vmem:[#allocation2 + $0x98] sm:$0xff] %vm272_vm0, %v2618_v41  ;;  %v2640_v45 = vld [vmem:[%s2482_s30 + $0x110] sm:$0xff]  ;;  %293 = vst.msk [vmem:[#allocation2 + $0xa0] sm:$0xff] %vm272_vm0, %v2629_v44  ;;  %442 = vrot.lane.b32.xlu0 %v2611_v38, %s2392_s4  ;;  %v2657_v50 = vld [vmem:[%s2482_s30 + $0x128] sm:$0xff]  ;;  %v2749_v35 = vsel %vm353_vm1, %v384_v21, %v385_v9  ;;  %v395_v53 = vrot.slane %v2604_v37, 1  ;;  %v394_v4 = vrot.slane %v2615_v40, 1 }
  0x2b   : > { %294 = vst.msk [vmem:[#allocation2 + $0xa8] sm:$0xff] %vm272_vm0, %v2626_v43  ;;  %3996 = vst [vmem:[#allocation7_spill] sm:$0xff] %v2652_v47  ;;  %v2660_v51 = vld [vmem:[%s2482_s30 + $0x120] sm:$0xff]  ;;  %v2671_v54 = vld [vmem:[%s2482_s30 + $0x88] sm:$0x3]  ;;  %v400_v21 = vrot.slane %v2618_v41, 1 }
  0x2c   : > { %295 = vst.msk [vmem:[#allocation2 + $0xb0] sm:$0xff] %vm272_vm0, %v2643_v46  ;;  %296 = vst.msk [vmem:[#allocation2 + $0xb8] sm:$0xff] %vm272_vm0, %v2640_v45  ;;  %v2674_v55 = vld [vmem:[%s2482_s30 + $0x140] sm:$0xff]  ;;  %v2681_v56 = vld [vmem:[%s2482_s30 + $0x138] sm:$0xff]  ;;  %v382_v61 = vrot.slane %v2671_v54, 1 }
  0x2d   : > { %3997 = vst [vmem:[#allocation8_spill] sm:$0xff] %v2667_v52  ;;  %297 = vst.msk [vmem:[#allocation2 + $0xc0] sm:$0xff] %vm272_vm0, %v2660_v51  ;;  %448 = vrot.lane.b32.xlu1 %v2652_v47, %s2392_s4  ;;  %v2688_v57 = vld [vmem:[%s2482_s30 + $0x158] sm:$0xff]  ;;  %v2691_v58 = vld [vmem:[%s2482_s30 + $0x150] sm:$0xff]  ;;  %v420_v47 = vrot.slane %v2674_v55, 1 }
  0x2e   : > { %298 = vst.msk [vmem:[#allocation2 + $0xc8] sm:$0xff] %vm272_vm0, %v2657_v50  ;;  %300 = vst.msk [vmem:[#allocation2 + $0xd8] sm:$0xff] %vm272_vm0, %v2674_v55  ;;  %446 = vrot.lane.b32.xlu0 %v2667_v52, %s2392_s4  ;;  %v2703_v62 = vld [vmem:[%s2482_s30 + $0x170] sm:$0xff]  ;;  %v2706_v63 = vld [vmem:[%s2482_s30 + $0x168] sm:$0xff]  ;;  %v2728_v8 = vsel %vm353_vm1, %v380_v60, %v382_v61  ;;  %v2765_v61 = vsel %vm353_vm1, %v389_v39, %v390_v26  ;;  %v399_v39 = vrot.slane %v2621_v42, 1 }
  0x2f   : > { %299 = vst.msk [vmem:[#allocation2 + $0xd0] sm:$0xff] %vm272_vm0, %v2681_v56  ;;  %3998 = vst [vmem:[#allocation9_spill] sm:$0xff] %v2698_v59  ;;  %v2717_v6 = vld [vmem:[%s2482_s30 + $0xa0] sm:$0x3]  ;;  %v2737_v22 = vld [vmem:[%s2482_s30 + $0xb8] sm:$0x3] }
  0x30   : > { %301 = vst.msk [vmem:[#allocation2 + $0xe0] sm:$0xff] %vm272_vm0, %v2691_v58  ;;  %302 = vst.msk [vmem:[#allocation2 + $0xe8] sm:$0xff] %vm272_vm0, %v2688_v57  ;;  %v387_v14 = vrot.slane %v2717_v6, 1  ;;  %v392_v34 = vrot.slane %v2737_v22, 1  ;;  %v2753_v48 = vld [vmem:[%s2482_s30 + $0xd0] sm:$0x3] }
  0x31   : > { %3999 = vst [vmem:[#allocation10_spill] sm:$0xff] %v2713_v3  ;;  %303 = vst.msk [vmem:[#allocation2 + $0xf0] sm:$0xff] %vm272_vm0, %v2706_v63  ;;  %452 = vrot.lane.b32.xlu1 %v2698_v59, %s2392_s4  ;;  %v397_v60 = vrot.slane %v2753_v48, 1  ;;  %v2849_v33 = vld [vmem:[%s2482_s30 + $0x160] sm:$0x3] }
  0x32   : > { %304 = vst.msk [vmem:[#allocation2 + $0xf8] sm:$0xff] %vm272_vm0, %v2703_v62  ;;  %450 = vrot.lane.b32.xlu0 %v2713_v3, %s2392_s4  ;;  %4000 = vst [vmem:[#allocation11_spill] sm:$0xff] %v2728_v8  ;;  %v2744_v25 = vsel %vm353_vm1, %v385_v9, %v387_v14  ;;  %v2760_v49 = vsel %vm353_vm1, %v390_v26, %v392_v34  ;;  %v2769_v9 = vld [vmem:[%s2482_s30 + $0xe8] sm:$0x3]  ;;  %v2781_v26 = vsel %vm353_vm1, %v394_v4, %v395_v53 }
  0x33   : > { %4001 = vst [vmem:[#allocation12_spill] sm:$0xff] %v2733_v17  ;;  %4002 = vst [vmem:[#allocation13_spill] sm:$0xff] %v2744_v25  ;;  %v2776_v14 = vsel %vm353_vm1, %v395_v53, %v397_v60  ;;  %v402_v34 = vrot.slane %v2769_v9, 1  ;;  %v2797_v53 = vsel %vm353_vm1, %v399_v39, %v400_v21  ;;  %v404_v4 = vrot.slane %v2629_v44, 1  ;;  %v2833_v3 = vld [vmem:[%s2482_s30 + $0x148] sm:$0x3] }
  0x34   : > { %4003 = vst [vmem:[#allocation14_spill] sm:$0xff] %v2749_v35  ;;  %4004 = vst [vmem:[#allocation15_spill] sm:$0xff] %v2760_v49  ;;  %v409_v39 = vrot.slane %v2643_v46, 1  ;;  %v422_v52 = vrot.slane %v2833_v3, 1 }
  0x35   : > { %456 = vrot.lane.b32.xlu1 %v2728_v8, %s2392_s4  ;;  %4005 = vst [vmem:[#allocation16_spill] sm:$0xff] %v2765_v61  ;;  %4006 = vst [vmem:[#allocation17_spill] sm:$0xff] %v2776_v14  ;;  %v2792_v60 = vsel %vm353_vm1, %v400_v21, %v402_v34  ;;  %v2817_v8 = vld [vmem:[%s2482_s30 + $0x130] sm:$0x3] }
  0x36   : > { %454 = vrot.lane.b32.xlu0 %v2733_v17, %s2392_s4  ;;  %4007 = vst [vmem:[#allocation18_spill] sm:$0xff] %v2781_v26  ;;  %v415_v17 = vrot.slane %v2657_v50, 1  ;;  %v417_v59 = vrot.slane %v2817_v8, 1 }
  0x39   : > { %460 = vrot.lane.b32.xlu1 %v2744_v25, %s2392_s4  ;;  %v2785_v25 = vld [vmem:[%s2482_s30 + $0x100] sm:$0x3] }
  0x3a   : > { %458 = vrot.lane.b32.xlu0 %v2749_v35, %s2392_s4  ;;  %v2801_v35 = vld [vmem:[%s2482_s30 + $0x118] sm:$0x3] }
  0x3d   : > { %464 = vrot.lane.b32.xlu1 %v2760_v49, %s2392_s4  ;;  %v405_v49 = vrot.slane %v2626_v43, 1 }
  0x3e   : > { %462 = vrot.lane.b32.xlu0 %v2765_v61, %s2392_s4  ;;  %v407_v61 = vrot.slane %v2785_v25, 1 }
  0x3f   : > { %v2813_v21 = vsel %vm353_vm1, %v404_v4, %v405_v49  ;;  %v414_v4 = vrot.slane %v2660_v51, 1 }
  0x40   : > { %v2808_v34 = vsel %vm353_vm1, %v405_v49, %v407_v61  ;;  %4009 = vst [vmem:[#allocation20_spill] sm:$0xff] %v2813_v21 }
  0x41   : > { %468 = vrot.lane.b32.xlu1 %v2776_v14, %s2392_s4  ;;  %4008 = vst [vmem:[#allocation19_spill] sm:$0xff] %v2808_v34  ;;  %v410_v14 = vrot.slane %v2640_v45, 1 }
  0x42   : > { %466 = vrot.lane.b32.xlu0 %v2781_v26, %s2392_s4  ;;  %v412_v26 = vrot.slane %v2801_v35, 1 }
  0x43   : > { %v2829_v49 = vsel %vm353_vm1, %v409_v39, %v410_v14  ;;  %v419_v39 = vrot.slane %v2681_v56, 1 }
  0x44   : > { %v2824_v61 = vsel %vm353_vm1, %v410_v14, %v412_v26  ;;  %4011 = vst [vmem:[#allocation22_spill] sm:$0xff] %v2829_v49  ;;  %v2840_v26 = vsel %vm353_vm1, %v415_v17, %v417_v59  ;;  %v2845_v14 = vsel %vm353_vm1, %v414_v4, %v415_v17  ;;  %v2856_v59 = vsel %vm353_vm1, %v420_v47, %v422_v52 }
  0x45   : > { %472 = vrot.lane.b32.xlu1 %v2792_v60, %s2392_s4  ;;  %4010 = vst [vmem:[#allocation21_spill] sm:$0xff] %v2824_v61  ;;  %4012 = vst [vmem:[#allocation23_spill] sm:$0xff] %v2840_v26  ;;  %v2861_v17 = vsel %vm353_vm1, %v419_v39, %v420_v47  ;;  %v424_v4 = vrot.slane %v2691_v58, 1  ;;  %v429_v39 = vrot.slane %v2706_v63, 1 }
  0x46   : > { %470 = vrot.lane.b32.xlu0 %v2797_v53, %s2392_s4  ;;  %4013 = vst [vmem:[#allocation24_spill] sm:$0xff] %v2845_v14  ;;  %4014 = vst [vmem:[#allocation25_spill] sm:$0xff] %v2856_v59 }
  0x47   : > { %4015 = vst [vmem:[#allocation26_spill] sm:$0xff] %v2861_v17 }
  0x49   : > { %476 = vrot.lane.b32.xlu1 %v2808_v34, %s2392_s4  ;;  %v2865_v34 = vld [vmem:[%s2482_s30 + $0x178] sm:$0x3] }
  0x4a   : > { %474 = vrot.lane.b32.xlu0 %v2813_v21, %s2392_s4 }
  0x4d   : > { %480 = vrot.lane.b32.xlu1 %v2824_v61, %s2392_s4  ;;  %v425_v61 = vrot.slane %v2688_v57, 1 }
  0x4e   : > { %478 = vrot.lane.b32.xlu0 %v2829_v49, %s2392_s4  ;;  %v427_v49 = vrot.slane %v2849_v33, 1 }
  0x4f   : > { %v2877_v47 = vsel %vm353_vm1, %v424_v4, %v425_v61 }
  0x50   : > { %v2872_v52 = vsel %vm353_vm1, %v425_v61, %v427_v49  ;;  %4017 = vst [vmem:[#allocation28_spill] sm:$0xff] %v2877_v47  ;;  %v565_v49 = vrot.slane %v2496_v5, 2  ;;  %v564_v61 = vrot.slane %v2491_v2, 2  ;;  %v572_v5 = vrot.slane %v2500_v7, 2 }
  0x51   : > { %484 = vrot.lane.b32.xlu1 %v2840_v26, %s2392_s4  ;;  %4016 = vst [vmem:[#allocation27_spill] sm:$0xff] %v2872_v52  ;;  %v430_v26 = vrot.slane %v2703_v62, 1  ;;  %v574_v7 = vrot.slane %v2517_v12, 2 }
  0x52   : > { %482 = vrot.lane.b32.xlu0 %v2845_v14, %s2392_s4  ;;  %v432_v14 = vrot.slane %v2865_v34, 1 }
  0x53   : > { %v2890_v21 = vsel %vm353_vm1, %v429_v39, %v430_v26  ;;  %v575_v39 = vrot.slane %v2514_v11, 2 }
  0x54   : > { %4019 = vst [vmem:[#allocation30_spill] sm:$0xff] %v2890_v21 }
  0x55   : > { %488 = vrot.lane.b32.xlu1 %v2856_v59, %s2392_s4  ;;  %v2885_v59 = vsel %vm353_vm1, %v430_v26, %v432_v14  ;;  %v570_v14 = vrot.slane %v2488_v1, 2  ;;  %v569_v26 = vrot.slane %v2485_v0, 2 }
  0x56   : > { %486 = vrot.lane.b32.xlu0 %v2861_v17, %s2392_s4  ;;  %4018 = vst [vmem:[#allocation29_spill] sm:$0xff] %v2885_v59  ;;  %v567_v17 = vrot.slane %v2511_v10, 2  ;;  %v566_v10 = vsel %vm563_vm2, %v564_v61, %v565_v49  ;;  %v580_v61 = vrot.slane %v2529_v16, 2 }
  0x57   : > { %v2905_v2 = vsel %vm563_vm2, %v570_v14, %v572_v5 }
  0x58   : > { %v568_v4 = vsel %vm563_vm2, %v565_v49, %v567_v17  ;;  %v577_v17 = vrot.slane %v2526_v15, 2  ;;  %v2923_v15 = vsel %vm563_vm2, %v574_v7, %v575_v39  ;;  %v590_v7 = vrot.slane %v2556_v24, 2 }
  0x59   : > { %492 = vrot.lane.b32.xlu1 %v2872_v52, %s2392_s4  ;;  %v602_v52 = vrot.slane %v2737_v22, 2 }
  0x5a   : > { %490 = vrot.lane.b32.xlu0 %v2877_v47, %s2392_s4  ;;  %v2918_v49 = vsel %vm563_vm2, %v575_v39, %v577_v17  ;;  %v584_v39 = vrot.slane %v2553_v23, 2  ;;  %v607_v47 = vrot.slane %v2753_v48, 2 }
  0x5d   : > { %496 = vrot.lane.b32.xlu1 %v2885_v59, %s2392_s4  ;;  %v2910_v59 = vsel %vm563_vm2, %v569_v26, %v570_v14  ;;  %v579_v14 = vrot.slane %v2539_v18, 2  ;;  %v587_v26 = vrot.slane %v2601_v36, 2 }
  0x5e   : > { %494 = vrot.lane.b32.xlu0 %v2890_v21, %s2392_s4  ;;  %v597_v21 = vrot.slane %v2717_v6, 2 }
  0x61   : > { %646 = vrot.lane.b32.xlu1 %v568_v4, %s2393_s5  ;;  %v582_v4 = vrot.slane %v2565_v27, 2  ;;  %v2936_v27 = vsel %vm563_vm2, %v579_v14, %v580_v61 }
  0x62   : > { %644 = vrot.lane.b32.xlu0 %v566_v10, %s2393_s5  ;;  %v585_v10 = vrot.slane %v2542_v19, 2 }
  0x63   : > { %v2931_v5 = vsel %vm563_vm2, %v580_v61, %v582_v4  ;;  %v592_v4 = vrot.slane %v2671_v54, 2  ;;  %v589_v61 = vrot.slane %v2568_v28, 2 }
  0x64   : > { %v2944_v17 = vsel %vm563_vm2, %v585_v10, %v587_v26  ;;  %v2949_v36 = vsel %vm563_vm2, %v584_v39, %v585_v10  ;;  %v595_v26 = vrot.slane %v2575_v29, 2  ;;  %v594_v10 = vrot.slane %v2578_v30, 2 }
  0x65   : > { %650 = vrot.lane.b32.xlu1 %v2905_v2, %s2393_s5  ;;  %v2957_v14 = vsel %vm563_vm2, %v590_v7, %v592_v4  ;;  %v2962_v54 = vsel %vm563_vm2, %v589_v61, %v590_v7  ;;  %v600_v4 = vrot.slane %v2585_v31, 2  ;;  %v599_v7 = vrot.slane %v2588_v32, 2 }
  0x66   : > { %648 = vrot.lane.b32.xlu0 %v2910_v59, %s2393_s5  ;;  %4020 = vst [vmem:[#allocation31_spill] sm:$0xff] %v2957_v14  ;;  %4021 = vst [vmem:[#allocation32_spill] sm:$0xff] %v2962_v54  ;;  %v2970_v39 = vsel %vm563_vm2, %v595_v26, %v597_v21  ;;  %v2975_v6 = vsel %vm563_vm2, %v594_v10, %v595_v26  ;;  %v605_v21 = vrot.slane %v2604_v37, 2  ;;  %v604_v26 = vrot.slane %v2615_v40, 2 }
  0x67   : > { %4022 = vst [vmem:[#allocation33_spill] sm:$0xff] %v2970_v39  ;;  %4023 = vst [vmem:[#allocation34_spill] sm:$0xff] %v2975_v6  ;;  %v2983_v61 = vsel %vm563_vm2, %v600_v4, %v602_v52  ;;  %v2988_v22 = vsel %vm563_vm2, %v599_v7, %v600_v4  ;;  %v610_v52 = vrot.slane %v2618_v41, 2  ;;  %v609_v4 = vrot.slane %v2621_v42, 2 }
  0x68   : > { %4024 = vst [vmem:[#allocation35_spill] sm:$0xff] %v2983_v61  ;;  %4025 = vst [vmem:[#allocation36_spill] sm:$0xff] %v2988_v22  ;;  %v2996_v10 = vsel %vm563_vm2, %v605_v21, %v607_v47  ;;  %v3001_v48 = vsel %vm563_vm2, %v604_v26, %v605_v21  ;;  %v615_v47 = vrot.slane %v2626_v43, 2  ;;  %v614_v21 = vrot.slane %v2629_v44, 2 }
  0x69   : > { %654 = vrot.lane.b32.xlu1 %v2918_v49, %s2393_s5  ;;  %4026 = vst [vmem:[#allocation37_spill] sm:$0xff] %v2996_v10  ;;  %4027 = vst [vmem:[#allocation38_spill] sm:$0xff] %v3001_v48 }
  0x6a   : > { %652 = vrot.lane.b32.xlu0 %v2923_v15, %s2393_s5 }
  0x6d   : > { %658 = vrot.lane.b32.xlu1 %v2931_v5, %s2393_s5 }
  0x6e   : > { %656 = vrot.lane.b32.xlu0 %v2936_v27, %s2393_s5 }
  0x71   : > { %662 = vrot.lane.b32.xlu1 %v2944_v17, %s2393_s5 }
  0x72   : > { %660 = vrot.lane.b32.xlu0 %v2949_v36, %s2393_s5 }
  0x75   : > { %666 = vrot.lane.b32.xlu1 %v2957_v14, %s2393_s5 }
  0x76   : > { %664 = vrot.lane.b32.xlu0 %v2962_v54, %s2393_s5 }
  0x79   : > { %670 = vrot.lane.b32.xlu1 %v2970_v39, %s2393_s5  ;;  %v612_v39 = vrot.slane %v2769_v9, 2  ;;  %v3014_v9 = vsel %vm563_vm2, %v609_v4, %v610_v52 }
  0x7a   : > { %668 = vrot.lane.b32.xlu0 %v2975_v6, %s2393_s5  ;;  %v637_v6 = vrot.slane %v2849_v33, 2  ;;  %v640_v33 = vrot.slane %v2703_v62, 2 }
  0x7b   : > { %v3009_v7 = vsel %vm563_vm2, %v610_v52, %v612_v39  ;;  %v620_v39 = vrot.slane %v2640_v45, 2  ;;  %v619_v52 = vrot.slane %v2643_v46, 2 }
  0x7d   : > { %674 = vrot.lane.b32.xlu1 %v2983_v61, %s2393_s5  ;;  %v617_v61 = vrot.slane %v2785_v25, 2  ;;  %v3027_v25 = vsel %vm563_vm2, %v614_v21, %v615_v47 }
  0x7e   : > { %672 = vrot.lane.b32.xlu0 %v2988_v22, %s2393_s5  ;;  %v632_v22 = vrot.slane %v2833_v3, 2 }
  0x7f   : > { %v3022_v26 = vsel %vm563_vm2, %v615_v47, %v617_v61  ;;  %v625_v61 = vrot.slane %v2657_v50, 2  ;;  %v624_v47 = vrot.slane %v2660_v51, 2 }
  0x81   : > { %678 = vrot.lane.b32.xlu1 %v2996_v10, %s2393_s5  ;;  %v622_v10 = vrot.slane %v2801_v35, 2  ;;  %v3040_v35 = vsel %vm563_vm2, %v619_v52, %v620_v39 }
  0x82   : > { %676 = vrot.lane.b32.xlu0 %v3001_v48, %s2393_s5  ;;  %v627_v48 = vrot.slane %v2817_v8, 2  ;;  %v3053_v8 = vsel %vm563_vm2, %v624_v47, %v625_v61  ;;  %v634_v47 = vrot.slane %v2691_v58, 2 }
  0x83   : > { %v3035_v4 = vsel %vm563_vm2, %v620_v39, %v622_v10  ;;  %v630_v10 = vrot.slane %v2674_v55, 2  ;;  %v629_v39 = vrot.slane %v2681_v56, 2 }
  0x84   : > { %v3048_v21 = vsel %vm563_vm2, %v625_v61, %v627_v48  ;;  %v635_v48 = vrot.slane %v2688_v57, 2 }
  0x85   : > { %682 = vrot.lane.b32.xlu1 %v3009_v7, %s2393_s5  ;;  %v3061_v52 = vsel %vm563_vm2, %v630_v10, %v632_v22  ;;  %v3066_v61 = vsel %vm563_vm2, %v629_v39, %v630_v10  ;;  %v642_v10 = vrot.slane %v2865_v34, 2 }
  0x86   : > { %680 = vrot.lane.b32.xlu0 %v3014_v9, %s2393_s5  ;;  %v3076_v22 = vsel %vm563_vm2, %v635_v48, %v637_v6  ;;  %v3081_v54 = vsel %vm563_vm2, %v634_v47, %v635_v48 }
  0x87   : > { %v3091_v6 = vsel %vm563_vm2, %v640_v33, %v642_v10 }
  0x89   : > { %686 = vrot.lane.b32.xlu1 %v3022_v26, %s2393_s5 }
  0x8a   : > { %684 = vrot.lane.b32.xlu0 %v3027_v25, %s2393_s5 }
  0x8d   : > { %690 = vrot.lane.b32.xlu1 %v3035_v4, %s2393_s5 }
  0x8e   : > { %688 = vrot.lane.b32.xlu0 %v3040_v35, %s2393_s5 }
  0x91   : > { %694 = vrot.lane.b32.xlu1 %v3048_v21, %s2393_s5 }
  0x92   : > { %692 = vrot.lane.b32.xlu0 %v3053_v8, %s2393_s5 }
  0x93   : > { %v439_v3 = vpop.permute.xlu1 %438 }
  0x94   : > { %533 = vst.msk [vmem:[#allocation2 + $0x10] sm:$0xff] %vm530_vm3, %v439_v3  ;;  %v435_v14 = vpop.permute.xlu0 %434  ;;  %v639_v3 = vrot.slane %v2706_v63, 2 }
  0x95   : > { %531 = vst.msk [vmem:[#allocation2] sm:$0xff] %vm530_vm3, %v435_v14  ;;  %698 = vrot.lane.b32.xlu1 %v3061_v52, %s2393_s5 }
  0x96   : > { %696 = vrot.lane.b32.xlu0 %v3066_v61, %s2393_s5  ;;  %v3094_v48 = vsel %vm563_vm2, %v639_v3, %v640_v33 }
  0x97   : > { %v441_v39 = vpop.permute.xlu1 %440 }
  0x98   : > { %534 = vst.msk [vmem:[#allocation2 + $0x18] sm:$0xff] %vm530_vm3, %v441_v39  ;;  %v437_v14 = vpop.permute.xlu0 %436 }
  0x99   : > { %532 = vst.msk [vmem:[#allocation2 + $0x8] sm:$0xff] %vm530_vm3, %v437_v14  ;;  %702 = vrot.lane.b32.xlu1 %v3076_v22, %s2393_s5 }
  0x9a   : > { %700 = vrot.lane.b32.xlu0 %v3081_v54, %s2393_s5 }
  0x9b   : > { %v445_v34 = vpop.permute.xlu1 %444 }
  0x9c   : > { %536 = vst.msk [vmem:[#allocation2 + $0x28] sm:$0xff] %vm530_vm3, %v445_v34  ;;  %v443_v47 = vpop.permute.xlu0 %442 }
  0x9d   : > { %535 = vst.msk [vmem:[#allocation2 + $0x20] sm:$0xff] %vm530_vm3, %v443_v47  ;;  %706 = vrot.lane.b32.xlu1 %v3091_v6, %s2393_s5 }
  0x9e   : > { %704 = vrot.lane.b32.xlu0 %v3094_v48, %s2393_s5 }
  0x9f   : > { %v449_v39 = vpop.permute.xlu1 %448 }
  0xa0   : > { %538 = vst.msk [vmem:[#allocation2 + $0x38] sm:$0xff] %vm530_vm3, %v449_v39  ;;  %v447_v10 = vpop.permute.xlu0 %446 }
  0xa1   : > { %537 = vst.msk [vmem:[#allocation2 + $0x30] sm:$0xff] %vm530_vm3, %v447_v10  ;;  %777 = vrot.lane.b32.xlu1 %v2488_v1, %s2394_s6 }
  0xa2   : > { %775 = vrot.lane.b32.xlu0 %v2485_v0, %s2394_s6 }
  0xa3   : > { %v453_v33 = vpop.permute.xlu1 %452 }
  0xa4   : > { %540 = vst.msk [vmem:[#allocation2 + $0x48] sm:$0xff] %vm530_vm3, %v453_v33  ;;  %v451_v3 = vpop.permute.xlu0 %450 }
  0xa5   : > { %539 = vst.msk [vmem:[#allocation2 + $0x40] sm:$0xff] %vm530_vm3, %v451_v3  ;;  %781 = vrot.lane.b32.xlu1 %v2514_v11, %s2394_s6 }
  0xa6   : > { %779 = vrot.lane.b32.xlu0 %v2517_v12, %s2394_s6 }
  0xa7   : > { %v457_v14 = vpop.permute.xlu1 %456 }
  0xa8   : > { %542 = vst.msk [vmem:[#allocation2 + $0x58] sm:$0xff] %vm530_vm3, %v457_v14  ;;  %v455_v34 = vpop.permute.xlu0 %454 }
  0xa9   : > { %541 = vst.msk [vmem:[#allocation2 + $0x50] sm:$0xff] %vm530_vm3, %v455_v34  ;;  %785 = vrot.lane.b32.xlu1 %v2529_v16, %s2394_s6 }
  0xaa   : > { %783 = vrot.lane.b32.xlu0 %v2539_v18, %s2394_s6 }
  0xab   : > { %v461_v0 = vpop.permute.xlu1 %460 }
  0xac   : > { %544 = vst.msk [vmem:[#allocation2 + $0x68] sm:$0xff] %vm530_vm3, %v461_v0  ;;  %v459_v1 = vpop.permute.xlu0 %458 }
  0xad   : > { %543 = vst.msk [vmem:[#allocation2 + $0x60] sm:$0xff] %vm530_vm3, %v459_v1  ;;  %789 = vrot.lane.b32.xlu1 %v2542_v19, %s2394_s6 }
  0xae   : > { %787 = vrot.lane.b32.xlu0 %v2553_v23, %s2394_s6 }
  0xaf   : > { %v465_v47 = vpop.permute.xlu1 %464 }
  0xb0   : > { %546 = vst.msk [vmem:[#allocation2 + $0x78] sm:$0xff] %vm530_vm3, %v465_v47  ;;  %v463_v39 = vpop.permute.xlu0 %462 }
  0xb1   : > { %545 = vst.msk [vmem:[#allocation2 + $0x70] sm:$0xff] %vm530_vm3, %v463_v39  ;;  %793 = vrot.lane.b32.xlu1 %v2556_v24, %s2394_s6 }
  0xb2   : > { %791 = vrot.lane.b32.xlu0 %v2568_v28, %s2394_s6 }
  0xb3   : > { %v469_v10 = vpop.permute.xlu1 %468 }
  0xb4   : > { %548 = vst.msk [vmem:[#allocation2 + $0x88] sm:$0xff] %vm530_vm3, %v469_v10  ;;  %v467_v33 = vpop.permute.xlu0 %466 }
  0xb5   : > { %547 = vst.msk [vmem:[#allocation2 + $0x80] sm:$0xff] %vm530_vm3, %v467_v33  ;;  %797 = vrot.lane.b32.xlu1 %v2575_v29, %s2394_s6 }
  0xb6   : > { %795 = vrot.lane.b32.xlu0 %v2578_v30, %s2394_s6 }
  0xb7   : > { %v473_v3 = vpop.permute.xlu1 %472 }
  0xb8   : > { %550 = vst.msk [vmem:[#allocation2 + $0x98] sm:$0xff] %vm530_vm3, %v473_v3  ;;  %v471_v14 = vpop.permute.xlu0 %470 }
  0xb9   : > { %549 = vst.msk [vmem:[#allocation2 + $0x90] sm:$0xff] %vm530_vm3, %v471_v14  ;;  %801 = vrot.lane.b32.xlu1 %v2585_v31, %s2394_s6 }
  0xba   : > { %799 = vrot.lane.b32.xlu0 %v2588_v32, %s2394_s6 }
  0xbb   : > { %v477_v34 = vpop.permute.xlu1 %476 }
  0xbc   : > { %552 = vst.msk [vmem:[#allocation2 + $0xa8] sm:$0xff] %vm530_vm3, %v477_v34  ;;  %v475_v0 = vpop.permute.xlu0 %474 }
  0xbd   : > { %551 = vst.msk [vmem:[#allocation2 + $0xa0] sm:$0xff] %vm530_vm3, %v475_v0  ;;  %805 = vrot.lane.b32.xlu1 %v2604_v37, %s2394_s6 }
  0xbe   : > { %803 = vrot.lane.b32.xlu0 %v2615_v40, %s2394_s6 }
  0xbf   : > { %v481_v1 = vpop.permute.xlu1 %480 }
  0xc0   : > { %554 = vst.msk [vmem:[#allocation2 + $0xb8] sm:$0xff] %vm530_vm3, %v481_v1  ;;  %v479_v47 = vpop.permute.xlu0 %478 }
  0xc1   : > { %553 = vst.msk [vmem:[#allocation2 + $0xb0] sm:$0xff] %vm530_vm3, %v479_v47  ;;  %809 = vrot.lane.b32.xlu1 %v2618_v41, %s2394_s6 }
  0xc2   : > { %807 = vrot.lane.b32.xlu0 %v2621_v42, %s2394_s6 }
  0xc3   : > { %v485_v39 = vpop.permute.xlu1 %484 }
  0xc4   : > { %556 = vst.msk [vmem:[#allocation2 + $0xc8] sm:$0xff] %vm530_vm3, %v485_v39  ;;  %v483_v10 = vpop.permute.xlu0 %482 }
  0xc5   : > { %555 = vst.msk [vmem:[#allocation2 + $0xc0] sm:$0xff] %vm530_vm3, %v483_v10  ;;  %813 = vrot.lane.b32.xlu1 %v2626_v43, %s2394_s6 }
  0xc6   : > { %811 = vrot.lane.b32.xlu0 %v2629_v44, %s2394_s6 }
  0xc7   : > { %v489_v33 = vpop.permute.xlu1 %488 }
  0xc8   : > { %558 = vst.msk [vmem:[#allocation2 + $0xd8] sm:$0xff] %vm530_vm3, %v489_v33  ;;  %v487_v3 = vpop.permute.xlu0 %486 }
  0xc9   : > { %557 = vst.msk [vmem:[#allocation2 + $0xd0] sm:$0xff] %vm530_vm3, %v487_v3  ;;  %817 = vrot.lane.b32.xlu1 %v2640_v45, %s2394_s6  ;;  %v3193_v3 = vld [vmem:[%s2482_s30 + $0x188] sm:$0xff] }
  0xca   : > { %815 = vrot.lane.b32.xlu0 %v2643_v46, %s2394_s6 }
  0xcb   : > { %v493_v14 = vpop.permute.xlu1 %492 }
  0xcc   : > { %560 = vst.msk [vmem:[#allocation2 + $0xe8] sm:$0xff] %vm530_vm3, %v493_v14  ;;  %v491_v34 = vpop.permute.xlu0 %490 }
  0xcd   : > { %559 = vst.msk [vmem:[#allocation2 + $0xe0] sm:$0xff] %vm530_vm3, %v491_v34  ;;  %821 = vrot.lane.b32.xlu1 %v2657_v50, %s2394_s6  ;;  %v3196_v34 = vld [vmem:[%s2482_s30 + $0x180] sm:$0xff] }
  0xce   : > { %819 = vrot.lane.b32.xlu0 %v2660_v51, %s2394_s6 }
  0xcf   : > { %v497_v0 = vpop.permute.xlu1 %496 }
  0xd0   : > { %562 = vst.msk [vmem:[#allocation2 + $0xf8] sm:$0xff] %vm530_vm3, %v497_v0  ;;  %v495_v1 = vpop.permute.xlu0 %494 }
  0xd1   : > { %561 = vst.msk [vmem:[#allocation2 + $0xf0] sm:$0xff] %vm530_vm3, %v495_v1  ;;  %825 = vrot.lane.b32.xlu1 %v2674_v55, %s2394_s6 }
  0xd2   : > { %823 = vrot.lane.b32.xlu0 %v2681_v56, %s2394_s6 }
  0xd3   : > { %v647_v47 = vpop.permute.xlu1 %646 }
  0xd4   : > { %742 = vst.msk [vmem:[#allocation2 + $0x8] sm:$0xff] %vm740_vm4, %v647_v47  ;;  %v645_v39 = vpop.permute.xlu0 %644 }
  0xd5   : > { %741 = vst.msk [vmem:[#allocation2] sm:$0xff] %vm740_vm4, %v645_v39  ;;  %829 = vrot.lane.b32.xlu1 %v2688_v57, %s2394_s6 }
  0xd6   : > { %827 = vrot.lane.b32.xlu0 %v2691_v58, %s2394_s6 }
  0xd7   : > { %v651_v10 = vpop.permute.xlu1 %650 }
  0xd8   : > { %744 = vst.msk [vmem:[#allocation2 + $0x18] sm:$0xff] %vm740_vm4, %v651_v10  ;;  %v649_v33 = vpop.permute.xlu0 %648 }
  0xd9   : > { %743 = vst.msk [vmem:[#allocation2 + $0x10] sm:$0xff] %vm740_vm4, %v649_v33  ;;  %833 = vrot.lane.b32.xlu1 %v2703_v62, %s2394_s6 }
  0xda   : > { %831 = vrot.lane.b32.xlu0 %v2706_v63, %s2394_s6 }
  0xdb   : > { %v655_v14 = vpop.permute.xlu1 %654 }
  0xdc   : > { %746 = vst.msk [vmem:[#allocation2 + $0x28] sm:$0xff] %vm740_vm4, %v655_v14  ;;  %v653_v0 = vpop.permute.xlu0 %652 }
  0xdd   : > { %745 = vst.msk [vmem:[#allocation2 + $0x20] sm:$0xff] %vm740_vm4, %v653_v0  ;;  %837 = vrot.lane.b32.xlu1 %v3193_v3, %s2394_s6 }
  0xde   : > { %835 = vrot.lane.b32.xlu0 %v3196_v34, %s2394_s6 }
  0xdf   : > { %v659_v1 = vpop.permute.xlu1 %658 }
  0xe0   : > { %748 = vst.msk [vmem:[#allocation2 + $0x38] sm:$0xff] %vm740_vm4, %v659_v1  ;;  %v657_v47 = vpop.permute.xlu0 %656 }
  0xe1   : > { %747 = vst.msk [vmem:[#allocation2 + $0x30] sm:$0xff] %vm740_vm4, %v657_v47  ;;  %912 = vrot.lane.b32.xlu1 %v2548_v20, %s2395_s7 }
  0xe2   : > { %910 = vrot.lane.b32.xlu0 %v2522_v13, %s2395_s7 }
  0xe3   : > { %v663_v39 = vpop.permute.xlu1 %662 }
  0xe4   : > { %750 = vst.msk [vmem:[#allocation2 + $0x48] sm:$0xff] %vm740_vm4, %v663_v39  ;;  %v661_v10 = vpop.permute.xlu0 %660 }
  0xe5   : > { %749 = vst.msk [vmem:[#allocation2 + $0x40] sm:$0xff] %vm740_vm4, %v661_v10  ;;  %942 = vrot.lane.b32.xlu1 %v2797_v53, %s2395_s7 }
  0xe6   : > { %914 = vrot.lane.b32.xlu0 %v2611_v38, %s2395_s7 }
  0xe7   : > { %v667_v33 = vpop.permute.xlu1 %666 }
  0xe8   : > { %752 = vst.msk [vmem:[#allocation2 + $0x58] sm:$0xff] %vm740_vm4, %v667_v33  ;;  %v665_v14 = vpop.permute.xlu0 %664 }
  0xe9   : > { %751 = vst.msk [vmem:[#allocation2 + $0x50] sm:$0xff] %vm740_vm4, %v665_v14  ;;  %1044 = vrot.lane.b32.xlu1 %v2910_v59, %s2396_s8  ;;  %v4029_v14 = vld [vmem:[#allocation19_spill] sm:$0xff] }
  0xea   : > { %944 = vrot.lane.b32.xlu0 %v2792_v60, %s2395_s7 }
  0xeb   : > { %v671_v13 = vpop.permute.xlu1 %670 }
  0xec   : > { %754 = vst.msk [vmem:[#allocation2 + $0x68] sm:$0xff] %vm740_vm4, %v671_v13  ;;  %v669_v20 = vpop.permute.xlu0 %668 }
  0xed   : > { %753 = vst.msk [vmem:[#allocation2 + $0x60] sm:$0xff] %vm740_vm4, %v669_v20  ;;  %1046 = vrot.lane.b32.xlu1 %v2905_v2, %s2396_s8  ;;  %v4030_v20 = vld [vmem:[#allocation6_spill] sm:$0xff] }
  0xee   : > { %1076 = vrot.lane.b32.xlu0 %v3014_v9, %s2396_s8 }
  0xef   : > { %v675_v0 = vpop.permute.xlu1 %674 }
  0xf0   : > { %756 = vst.msk [vmem:[#allocation2 + $0x78] sm:$0xff] %vm740_vm4, %v675_v0  ;;  %v673_v1 = vpop.permute.xlu0 %672 }
  0xf1   : > { %755 = vst.msk [vmem:[#allocation2 + $0x70] sm:$0xff] %vm740_vm4, %v673_v1  ;;  %1175 = vrot.lane.b32.xlu1 %v2517_v12, %s2397_s9 }
  0xf2   : > { %1078 = vrot.lane.b32.xlu0 %v3009_v7, %s2396_s8 }
  0xf3   : > { %v679_v59 = vpop.permute.xlu1 %678 }
  0xf4   : > { %758 = vst.msk [vmem:[#allocation2 + $0x88] sm:$0xff] %vm740_vm4, %v679_v59  ;;  %v677_v2 = vpop.permute.xlu0 %676  ;;  %v1607_v59 = vld [vmem:[%s3924_s1 + $0x10] sm:$0xff] }
  0xf5   : > { %757 = vst.msk [vmem:[#allocation2 + $0x80] sm:$0xff] %vm740_vm4, %v677_v2  ;;  %1177 = vrot.lane.b32.xlu1 %v2514_v11, %s2397_s9  ;;  %v1608_v2 = vld [vmem:[%s3924_s1 + $0x18] sm:$0xff] }
  0xf6   : > { %1207 = vrot.lane.b32.xlu0 %v2629_v44, %s2397_s9  ;;  %v4028_v44 = vld [vmem:[#allocation20_spill] sm:$0xff] }
  0xf7   : > { %v683_v47 = vpop.permute.xlu1 %682 }
  0xf8   : > { %760 = vst.msk [vmem:[#allocation2 + $0x98] sm:$0xff] %vm740_vm4, %v683_v47  ;;  %v681_v39 = vpop.permute.xlu0 %680  ;;  %v2237_v47 = vpack.c.bf16 %v1608_v2, %v1607_v59  ;;  %v4033_v59 = vld [vmem:[#allocation21_spill] sm:$0xff]  ;;  %v4034_v2 = vld [vmem:[#allocation7_spill] sm:$0xff] }
  0xf9   : > { %759 = vst.msk [vmem:[#allocation2 + $0x90] sm:$0xff] %vm740_vm4, %v681_v39  ;;  %1310 = vrot.lane.b32.xlu1 %v2611_v38, %s2398_s10  ;;  %v1605_v38 = vld [vmem:[%s3924_s1] sm:$0xff] }
  0xfa   : > { %1209 = vrot.lane.b32.xlu0 %v2626_v43, %s2397_s9  ;;  %v1606_v43 = vld [vmem:[%s3924_s1 + $0x8] sm:$0xff] }
  0xfb   : > { %v687_v12 = vpop.permute.xlu1 %686  ;;  %v2233_v13 = vpack.c.bf16 %v1606_v43, %v1605_v38 }
  0xfc   : > { %762 = vst.msk [vmem:[#allocation2 + $0xa8] sm:$0xff] %vm740_vm4, %v687_v12  ;;  %v685_v11 = vpop.permute.xlu0 %684 }
  0xfd   : > { %761 = vst.msk [vmem:[#allocation2 + $0xa0] sm:$0xff] %vm740_vm4, %v685_v11  ;;  %946 = vrot.lane.b32.xlu1 %v4028_v44, %s2395_s7  ;;  %2234 = vmatprep.subr.bf16.mxu0 %v2233_v13  ;;  %v1609_v11 = vld [vmem:[%s3924_s1 + $0x20] sm:$0xf] }
  0xfe   : > { %1342 = vrot.lane.b32.xlu0 %v4028_v44, %s2398_s10  ;;  %2241 = vmatprep.subr.bf16.mxu1 %v2233_v13 }
  0xff   : > { %v691_v10 = vpop.permute.xlu1 %690  ;;  %2236 = vmatpush3.bf16.msra.mxu0 %v2233_v13  ;;  %2244 = vmatpush3.bf16.msra.mxu1 %v2233_v13 }
 0x100   : > { %764 = vst.msk [vmem:[#allocation2 + $0xb8] sm:$0xff] %vm740_vm4, %v691_v10  ;;  %v689_v33 = vpop.permute.xlu0 %688  ;;  %2238 = vmatprep.subr.bf16.mxu0 %v2237_v47  ;;  %2242 = vmatprep.subr.bf16.mxu1 %v2237_v47 }
 0x101   : > { %763 = vst.msk [vmem:[#allocation2 + $0xb0] sm:$0xff] %vm740_vm4, %v689_v33  ;;  %1344 = vrot.lane.b32.xlu1 %v4029_v14, %s2398_s10 }
 0x102   : > { %1312 = vrot.lane.b32.xlu0 %v4030_v20, %s2398_s10 }
 0x103   : > { %v695_v0 = vpop.permute.xlu1 %694  ;;  %2240 = vmatpush3.bf16.msra.mxu0 %v2237_v47  ;;  %2245 = vmatpush3.bf16.msra.mxu1 %v2237_v47 }
 0x104   : > { %766 = vst.msk [vmem:[#allocation2 + $0xc8] sm:$0xff] %vm740_vm4, %v695_v0  ;;  %v693_v1 = vpop.permute.xlu0 %692  ;;  %2183 = vmatprep.subr.msk.mxu0 %vm1714_vm5, %v1609_v11  ;;  %2243 = vmatprep.subr.msk.mxu1 %vm1714_vm5, %v1609_v11 }
 0x105   : > { %765 = vst.msk [vmem:[#allocation2 + $0xc0] sm:$0xff] %vm740_vm4, %v693_v1  ;;  %1476 = vrot.lane.b32.xlu1 %v3027_v25, %s2399_s29 }
 0x106   : > { %1444 = vrot.lane.b32.xlu0 %v2923_v15, %s2399_s29 }
 0x107   : > { %v699_v39 = vpop.permute.xlu1 %698  ;;  %2184 = vmatpush3.msk.msra.mxu0 %vm1714_vm5, %v1609_v11  ;;  %2246 = vmatpush3.msk.msra.mxu1 %vm1714_vm5, %v1609_v11 }
 0x108   : > { %768 = vst.msk [vmem:[#allocation2 + $0xd8] sm:$0xff] %vm740_vm4, %v699_v39  ;;  %v697_v12 = vpop.permute.xlu0 %696 }
 0x109   : > { %767 = vst.msk [vmem:[#allocation2 + $0xd0] sm:$0xff] %vm740_vm4, %v697_v12  ;;  %948 = vrot.lane.b32.xlu1 %v4029_v14, %s2395_s7 }
 0x10a   : > { %916 = vrot.lane.b32.xlu0 %v4030_v20, %s2395_s7 }
 0x10b   : > { %v703_v44 = vpop.permute.xlu1 %702 }
 0x10c   : > { %770 = vst.msk [vmem:[#allocation2 + $0xe8] sm:$0xff] %vm740_vm4, %v703_v44  ;;  %v701_v10 = vpop.permute.xlu0 %700 }
 0x10d   : > { %769 = vst.msk [vmem:[#allocation2 + $0xe0] sm:$0xff] %vm740_vm4, %v701_v10  ;;  %1080 = vrot.lane.b32.xlu1 %v3027_v25, %s2396_s8 }
 0x10e   : > { %1048 = vrot.lane.b32.xlu0 %v2923_v15, %s2396_s8 }
 0x10f   : > { %v707_v33 = vpop.permute.xlu1 %706 }
 0x110   : > { %772 = vst.msk [vmem:[#allocation2 + $0xf8] sm:$0xff] %vm740_vm4, %v707_v33  ;;  %v705_v38 = vpop.permute.xlu0 %704 }
 0x111   : > { %771 = vst.msk [vmem:[#allocation2 + $0xf0] sm:$0xff] %vm740_vm4, %v705_v38  ;;  %1478 = vrot.lane.b32.xlu1 %v3022_v26, %s2399_s29 }
 0x112   : > { %1446 = vrot.lane.b32.xlu0 %v2918_v49, %s2399_s29 }
 0x113   : > { %v778_v43 = vpop.permute.xlu1 %777 }
 0x114   : > { %873 = vst.msk [vmem:[#allocation2 + $0x8] sm:$0xff] %vm871_vm6, %v778_v43  ;;  %v776_v25 = vpop.permute.xlu0 %775 }
 0x115   : > { %872 = vst.msk [vmem:[#allocation2] sm:$0xff] %vm871_vm6, %v776_v25  ;;  %1082 = vrot.lane.b32.xlu1 %v3022_v26, %s2396_s8 }
 0x116   : > { %1050 = vrot.lane.b32.xlu0 %v2918_v49, %s2396_s8 }
 0x117   : > { %v782_v15 = vpop.permute.xlu1 %781 }
 0x118   : > { %875 = vst.msk [vmem:[#allocation2 + $0x18] sm:$0xff] %vm871_vm6, %v782_v15  ;;  %v780_v14 = vpop.permute.xlu0 %779 }
 0x119   : > { %874 = vst.msk [vmem:[#allocation2 + $0x10] sm:$0xff] %vm871_vm6, %v780_v14  ;;  %1211 = vrot.lane.b32.xlu1 %v2643_v46, %s2397_s9  ;;  %v4032_v46 = vld [vmem:[#allocation8_spill] sm:$0xff] }
 0x11a   : > { %1179 = vrot.lane.b32.xlu0 %v2539_v18, %s2397_s9  ;;  %v4031_v18 = vld [vmem:[#allocation22_spill] sm:$0xff] }
 0x11b   : > { %v786_v13 = vpop.permute.xlu1 %785 }
 0x11c   : > { %877 = vst.msk [vmem:[#allocation2 + $0x28] sm:$0xff] %vm871_vm6, %v786_v13  ;;  %v784_v20 = vpop.permute.xlu0 %783 }
 0x11d   : > { %876 = vst.msk [vmem:[#allocation2 + $0x20] sm:$0xff] %vm871_vm6, %v784_v20  ;;  %1213 = vrot.lane.b32.xlu1 %v2640_v45, %s2397_s9 }
 0x11e   : > { %1181 = vrot.lane.b32.xlu0 %v2529_v16, %s2397_s9 }
 0x11f   : > { %v790_v49 = vpop.permute.xlu1 %789 }
 0x120   : > { %879 = vst.msk [vmem:[#allocation2 + $0x38] sm:$0xff] %vm871_vm6, %v790_v49  ;;  %v788_v26 = vpop.permute.xlu0 %787  ;;  %v4037_v49 = vld [vmem:[#allocation23_spill] sm:$0xff] }
 0x121   : > { %878 = vst.msk [vmem:[#allocation2 + $0x30] sm:$0xff] %vm871_vm6, %v788_v26  ;;  %1346 = vrot.lane.b32.xlu1 %v4031_v18, %s2398_s10  ;;  %v4038_v26 = vld [vmem:[#allocation9_spill] sm:$0xff] }
 0x122   : > { %1314 = vrot.lane.b32.xlu0 %v4032_v46, %s2398_s10 }
 0x123   : > { %v794_v0 = vpop.permute.xlu1 %793 }
 0x124   : > { %881 = vst.msk [vmem:[#allocation2 + $0x48] sm:$0xff] %vm871_vm6, %v794_v0  ;;  %v792_v1 = vpop.permute.xlu0 %791 }
 0x125   : > { %880 = vst.msk [vmem:[#allocation2 + $0x40] sm:$0xff] %vm871_vm6, %v792_v1  ;;  %950 = vrot.lane.b32.xlu1 %v4031_v18, %s2395_s7 }
 0x126   : > { %918 = vrot.lane.b32.xlu0 %v4032_v46, %s2395_s7 }
 0x127   : > { %v798_v16 = vpop.permute.xlu1 %797 }
 0x128   : > { %883 = vst.msk [vmem:[#allocation2 + $0x58] sm:$0xff] %vm871_vm6, %v798_v16  ;;  %v796_v45 = vpop.permute.xlu0 %795 }
 0x129   : > { %882 = vst.msk [vmem:[#allocation2 + $0x50] sm:$0xff] %vm871_vm6, %v796_v45  ;;  %1348 = vrot.lane.b32.xlu1 %v4033_v59, %s2398_s10 }
 0x12a   : > { %1316 = vrot.lane.b32.xlu0 %v4034_v2, %s2398_s10 }
 0x12b   : > { %v802_v47 = vpop.permute.xlu1 %801 }
 0x12c   : > { %885 = vst.msk [vmem:[#allocation2 + $0x68] sm:$0xff] %vm871_vm6, %v802_v47  ;;  %v800_v39 = vpop.permute.xlu0 %799 }
 0x12d   : > { %884 = vst.msk [vmem:[#allocation2 + $0x60] sm:$0xff] %vm871_vm6, %v800_v39  ;;  %1480 = vrot.lane.b32.xlu1 %v3040_v35, %s2399_s29 }
 0x12e   : > { %1448 = vrot.lane.b32.xlu0 %v2936_v27, %s2399_s29 }
 0x12f   : > { %v806_v12 = vpop.permute.xlu1 %805 }
 0x130   : > { %887 = vst.msk [vmem:[#allocation2 + $0x78] sm:$0xff] %vm871_vm6, %v806_v12  ;;  %v804_v11 = vpop.permute.xlu0 %803 }
 0x131   : > { %886 = vst.msk [vmem:[#allocation2 + $0x70] sm:$0xff] %vm871_vm6, %v804_v11  ;;  %952 = vrot.lane.b32.xlu1 %v4033_v59, %s2395_s7  ;;  %v4040_v11 = vld [vmem:[#allocation12_spill] sm:$0xff] }
 0x132   : > { %920 = vrot.lane.b32.xlu0 %v4034_v2, %s2395_s7 }
 0x133   : > { %v810_v44 = vpop.permute.xlu1 %809 }
 0x134   : > { %889 = vst.msk [vmem:[#allocation2 + $0x88] sm:$0xff] %vm871_vm6, %v810_v44  ;;  %v808_v10 = vpop.permute.xlu0 %807 }
 0x135   : > { %888 = vst.msk [vmem:[#allocation2 + $0x80] sm:$0xff] %vm871_vm6, %v808_v10  ;;  %1084 = vrot.lane.b32.xlu1 %v3040_v35, %s2396_s8 }
 0x136   : > { %1052 = vrot.lane.b32.xlu0 %v2936_v27, %s2396_s8 }
 0x137   : > { %v814_v33 = vpop.permute.xlu1 %813 }
 0x138   : > { %891 = vst.msk [vmem:[#allocation2 + $0x98] sm:$0xff] %vm871_vm6, %v814_v33  ;;  %v812_v38 = vpop.permute.xlu0 %811  ;;  %v4041_v33 = vld [vmem:[#allocation25_spill] sm:$0xff] }
 0x139   : > { %890 = vst.msk [vmem:[#allocation2 + $0x90] sm:$0xff] %vm871_vm6, %v812_v38  ;;  %1482 = vrot.lane.b32.xlu1 %v3035_v4, %s2399_s29  ;;  %v4042_v38 = vld [vmem:[#allocation11_spill] sm:$0xff] }
 0x13a   : > { %1450 = vrot.lane.b32.xlu0 %v2931_v5, %s2399_s29 }
 0x13b   : > { %v818_v43 = vpop.permute.xlu1 %817 }
 0x13c   : > { %893 = vst.msk [vmem:[#allocation2 + $0xa8] sm:$0xff] %vm871_vm6, %v818_v43  ;;  %v816_v25 = vpop.permute.xlu0 %815 }
 0x13d   : > { %892 = vst.msk [vmem:[#allocation2 + $0xa0] sm:$0xff] %vm871_vm6, %v816_v25  ;;  %1086 = vrot.lane.b32.xlu1 %v3035_v4, %s2396_s8 }
 0x13e   : > { %1054 = vrot.lane.b32.xlu0 %v2931_v5, %s2396_s8 }
 0x13f   : > { %v822_v27 = vpop.permute.xlu1 %821 }
 0x140   : > { %895 = vst.msk [vmem:[#allocation2 + $0xb8] sm:$0xff] %vm871_vm6, %v822_v27  ;;  %v820_v35 = vpop.permute.xlu0 %819  ;;  %v4043_v27 = vld [vmem:[#allocation32_spill] sm:$0xff] }
 0x141   : > { %894 = vst.msk [vmem:[#allocation2 + $0xb0] sm:$0xff] %vm871_vm6, %v820_v35  ;;  %1215 = vrot.lane.b32.xlu1 %v2660_v51, %s2397_s9  ;;  %v4036_v51 = vld [vmem:[#allocation10_spill] sm:$0xff] }
 0x142   : > { %1183 = vrot.lane.b32.xlu0 %v2553_v23, %s2397_s9  ;;  %v4035_v23 = vld [vmem:[#allocation24_spill] sm:$0xff] }
 0x143   : > { %v826_v15 = vpop.permute.xlu1 %825 }
 0x144   : > { %897 = vst.msk [vmem:[#allocation2 + $0xc8] sm:$0xff] %vm871_vm6, %v826_v15  ;;  %v824_v14 = vpop.permute.xlu0 %823 }
 0x145   : > { %896 = vst.msk [vmem:[#allocation2 + $0xc0] sm:$0xff] %vm871_vm6, %v824_v14  ;;  %1217 = vrot.lane.b32.xlu1 %v2657_v50, %s2397_s9 }
 0x146   : > { %1185 = vrot.lane.b32.xlu0 %v2542_v19, %s2397_s9 }
 0x147   : > { %v830_v5 = vpop.permute.xlu1 %829 }
 0x148   : > { %899 = vst.msk [vmem:[#allocation2 + $0xd8] sm:$0xff] %vm871_vm6, %v830_v5  ;;  %v828_v4 = vpop.permute.xlu0 %827 }
 0x149   : > { %898 = vst.msk [vmem:[#allocation2 + $0xd0] sm:$0xff] %vm871_vm6, %v828_v4  ;;  %1350 = vrot.lane.b32.xlu1 %v4035_v23, %s2398_s10 }
 0x14a   : > { %1318 = vrot.lane.b32.xlu0 %v4036_v51, %s2398_s10 }
 0x14b   : > { %v834_v13 = vpop.permute.xlu1 %833 }
 0x14c   : > { %901 = vst.msk [vmem:[#allocation2 + $0xe8] sm:$0xff] %vm871_vm6, %v834_v13  ;;  %v832_v20 = vpop.permute.xlu0 %831 }
 0x14d   : > { %900 = vst.msk [vmem:[#allocation2 + $0xe0] sm:$0xff] %vm871_vm6, %v832_v20  ;;  %954 = vrot.lane.b32.xlu1 %v4035_v23, %s2395_s7  ;;  %v4044_v20 = vld [vmem:[#allocation31_spill] sm:$0xff] }
 0x14e   : > { %922 = vrot.lane.b32.xlu0 %v4036_v51, %s2395_s7 }
 0x14f   : > { %v838_v19 = vpop.permute.xlu1 %837 }
 0x150   : > { %903 = vst.msk [vmem:[#allocation2 + $0xf8] sm:$0xff] %vm871_vm6, %v838_v19  ;;  %v836_v50 = vpop.permute.xlu0 %835 }
 0x151   : > { %902 = vst.msk [vmem:[#allocation2 + $0xf0] sm:$0xff] %vm871_vm6, %v836_v50  ;;  %1352 = vrot.lane.b32.xlu1 %v4037_v49, %s2398_s10 }
 0x152   : > { %1320 = vrot.lane.b32.xlu0 %v4038_v26, %s2398_s10 }
 0x153   : > { %v913_v18 = vpop.permute.xlu1 %912 }
 0x154   : > { %1008 = vst.msk [vmem:[#allocation2 + $0x8] sm:$0xff] %vm1006_vm7, %v913_v18  ;;  %v911_v46 = vpop.permute.xlu0 %910 }
 0x155   : > { %1007 = vst.msk [vmem:[#allocation2] sm:$0xff] %vm1006_vm7, %v911_v46  ;;  %1484 = vrot.lane.b32.xlu1 %v3053_v8, %s2399_s29 }
 0x156   : > { %1452 = vrot.lane.b32.xlu0 %v2949_v36, %s2399_s29 }
 0x157   : > { %v943_v0 = vpop.permute.xlu1 %942 }
 0x158   : > { %1023 = vst.msk [vmem:[#allocation2 + $0x80] sm:$0xff] %vm1006_vm7, %v943_v0  ;;  %v915_v1 = vpop.permute.xlu0 %914 }
 0x159   : > { %1009 = vst.msk [vmem:[#allocation2 + $0x10] sm:$0xff] %vm1006_vm7, %v915_v1  ;;  %956 = vrot.lane.b32.xlu1 %v4037_v49, %s2395_s7 }
 0x15a   : > { %924 = vrot.lane.b32.xlu0 %v4038_v26, %s2395_s7 }
 0x15b   : > { %v1045_v16 = vpop.permute.xlu1 %1044 }
 0x15c   : > { %1141 = vst.msk [vmem:[#allocation2] sm:$0xff] %vm1140_vm8, %v1045_v16  ;;  %v945_v45 = vpop.permute.xlu0 %944 }
 0x15d   : > { %1024 = vst.msk [vmem:[#allocation2 + $0x88] sm:$0xff] %vm1006_vm7, %v945_v45  ;;  %1088 = vrot.lane.b32.xlu1 %v3053_v8, %s2396_s8 }
 0x15e   : > { %1056 = vrot.lane.b32.xlu0 %v2949_v36, %s2396_s8 }
 0x15f   : > { %v1047_v59 = vpop.permute.xlu1 %1046 }
 0x160   : > { %1142 = vst.msk [vmem:[#allocation2 + $0x8] sm:$0xff] %vm1140_vm8, %v1047_v59  ;;  %v1077_v2 = vpop.permute.xlu0 %1076  ;;  %v4047_v59 = vld [vmem:[#allocation27_spill] sm:$0xff] }
 0x161   : > { %1157 = vst.msk [vmem:[#allocation2 + $0x80] sm:$0xff] %vm1140_vm8, %v1077_v2  ;;  %1486 = vrot.lane.b32.xlu1 %v3048_v21, %s2399_s29  ;;  %v4048_v2 = vld [vmem:[#allocation13_spill] sm:$0xff] }
 0x162   : > { %1454 = vrot.lane.b32.xlu0 %v2944_v17, %s2399_s29 }
 0x163   : > { %v1176_v47 = vpop.permute.xlu1 %1175 }
 0x164   : > { %1272 = vst.msk [vmem:[#allocation2] sm:$0xff] %vm1271_vm9, %v1176_v47  ;;  %v1079_v8 = vpop.permute.xlu0 %1078 }
 0x165   : > { %1158 = vst.msk [vmem:[#allocation2 + $0x88] sm:$0xff] %vm1140_vm8, %v1079_v8  ;;  %1090 = vrot.lane.b32.xlu1 %v3048_v21, %s2396_s8 }
 0x166   : > { %1058 = vrot.lane.b32.xlu0 %v2944_v17, %s2396_s8 }
 0x167   : > { %v1178_v36 = vpop.permute.xlu1 %1177 }
 0x168   : > { %1273 = vst.msk [vmem:[#allocation2 + $0x8] sm:$0xff] %vm1271_vm9, %v1178_v36  ;;  %v1208_v39 = vpop.permute.xlu0 %1207  ;;  %v4049_v36 = vld [vmem:[#allocation34_spill] sm:$0xff] }
 0x169   : > { %1288 = vst.msk [vmem:[#allocation2 + $0x80] sm:$0xff] %vm1271_vm9, %v1208_v39  ;;  %1219 = vrot.lane.b32.xlu1 %v2681_v56, %s2397_s9 }
 0x16a   : > { %1187 = vrot.lane.b32.xlu0 %v2568_v28, %s2397_s9  ;;  %v4039_v28 = vld [vmem:[#allocation26_spill] sm:$0xff] }
 0x16b   : > { %v1311_v12 = vpop.permute.xlu1 %1310 }
 0x16c   : > { %1407 = vst.msk [vmem:[#allocation2] sm:$0xff] %vm1406_vm10, %v1311_v12  ;;  %v1210_v21 = vpop.permute.xlu0 %1209 }
 0x16d   : > { %1289 = vst.msk [vmem:[#allocation2 + $0x88] sm:$0xff] %vm1271_vm9, %v1210_v21  ;;  %1221 = vrot.lane.b32.xlu1 %v2674_v55, %s2397_s9 }
 0x16e   : > { %1189 = vrot.lane.b32.xlu0 %v2556_v24, %s2397_s9 }
 0x16f   : > { %v947_v17 = vpop.permute.xlu1 %946 }
 0x170   : > { %1025 = vst.msk [vmem:[#allocation2 + $0x90] sm:$0xff] %vm1006_vm7, %v947_v17  ;;  %v1343_v56 = vpop.permute.xlu0 %1342 }
 0x171   : > { %1423 = vst.msk [vmem:[#allocation2 + $0x80] sm:$0xff] %vm1406_vm10, %v1343_v56  ;;  %1354 = vrot.lane.b32.xlu1 %v4039_v28, %s2398_s10 }
 0x172   : > { %1322 = vrot.lane.b32.xlu0 %v4040_v11, %s2398_s10 }
 0x173   : > { %v1345_v44 = vpop.permute.xlu1 %1344 }
 0x174   : > { %1424 = vst.msk [vmem:[#allocation2 + $0x88] sm:$0xff] %vm1406_vm10, %v1345_v44  ;;  %v1313_v10 = vpop.permute.xlu0 %1312 }
 0x175   : > { %1408 = vst.msk [vmem:[#allocation2 + $0x8] sm:$0xff] %vm1406_vm10, %v1313_v10  ;;  %958 = vrot.lane.b32.xlu1 %v4039_v28, %s2395_s7  ;;  %v4050_v10 = vld [vmem:[#allocation33_spill] sm:$0xff] }
 0x176   : > { %926 = vrot.lane.b32.xlu0 %v4040_v11, %s2395_s7 }
 0x177   : > { %v1477_v24 = vpop.permute.xlu1 %1476 }
 0x178   : > { %1557 = vst.msk [vmem:[#allocation2 + $0x80] sm:$0xff] %vm1540_vm11, %v1477_v24  ;;  %v1445_v55 = vpop.permute.xlu0 %1444 }
 0x179   : > { %1541 = vst.msk [vmem:[#allocation2] sm:$0xff] %vm1540_vm11, %v1445_v55  ;;  %1356 = vrot.lane.b32.xlu1 %v4041_v33, %s2398_s10 }
 0x17a   : > { %1324 = vrot.lane.b32.xlu0 %v4042_v38, %s2398_s10 }
 0x17b   : > { %v949_v43 = vpop.permute.xlu1 %948 }
 0x17c   : > { %1026 = vst.msk [vmem:[#allocation2 + $0x98] sm:$0xff] %vm1006_vm7, %v949_v43  ;;  %v917_v25 = vpop.permute.xlu0 %916 }
 0x17d   : > { %1010 = vst.msk [vmem:[#allocation2 + $0x18] sm:$0xff] %vm1006_vm7, %v917_v25  ;;  %1488 = vrot.lane.b32.xlu1 %v3066_v61, %s2399_s29 }
 0x17e   : > { %1456 = vrot.lane.b32.xlu0 %v4043_v27, %s2399_s29 }
 0x17f   : > { %v1081_v35 = vpop.permute.xlu1 %1080  ;;  %v1589_v15 = vld [vmem:[#allocation2 + $0x80] sm:$0xff] }
 0x180   : > { %1159 = vst.msk [vmem:[#allocation2 + $0x90] sm:$0xff] %vm1140_vm8, %v1081_v35  ;;  %v1049_v14 = vpop.permute.xlu0 %1048  ;;  %v1573_v5 = vld [vmem:[#allocation2] sm:$0xff]  ;;  %2209 = vmatprep.mubr.msk.f32.mxu1 %vm1617_vm12, %v1589_v15 }
 0x181   : > { %1143 = vst.msk [vmem:[#allocation2 + $0x10] sm:$0xff] %vm1140_vm8, %v1049_v14  ;;  %2185 = vmatprep.mubr.msk.f32.mxu0 %vm1617_vm12, %v1573_v5  ;;  %960 = vrot.lane.b32.xlu1 %v4041_v33, %s2395_s7  ;;  %v4053_v5 = vld [vmem:[#allocation29_spill] sm:$0xff] }
 0x182   : > { %928 = vrot.lane.b32.xlu0 %v4042_v38, %s2395_s7 }
 0x183   : > { %v1479_v4 = vpop.permute.xlu1 %1478 }
 0x184   : > { %1558 = vst.msk [vmem:[#allocation2 + $0x88] sm:$0xff] %vm1540_vm11, %v1479_v4  ;;  %v1447_v23 = vpop.permute.xlu0 %1446  ;;  %v4054_v4 = vld [vmem:[#allocation15_spill] sm:$0xff] }
 0x185   : > { %1542 = vst.msk [vmem:[#allocation2 + $0x8] sm:$0xff] %vm1540_vm11, %v1447_v23  ;;  %1092 = vrot.lane.b32.xlu1 %v3066_v61, %s2396_s8 }
 0x186   : > { %1060 = vrot.lane.b32.xlu0 %v4043_v27, %s2396_s8 }
 0x187   : > { %v1083_v51 = vpop.permute.xlu1 %1082 }
 0x188   : > { %1160 = vst.msk [vmem:[#allocation2 + $0x98] sm:$0xff] %vm1140_vm8, %v1083_v51  ;;  %v1051_v13 = vpop.permute.xlu0 %1050 }
 0x189   : > { %1144 = vst.msk [vmem:[#allocation2 + $0x18] sm:$0xff] %vm1140_vm8, %v1051_v13  ;;  %1490 = vrot.lane.b32.xlu1 %v3061_v52, %s2399_s29  ;;  %v4055_v13 = vld [vmem:[#allocation36_spill] sm:$0xff] }
 0x18a   : > { %1458 = vrot.lane.b32.xlu0 %v4044_v20, %s2399_s29 }
 0x18b   : > { %v1212_v19 = vpop.permute.xlu1 %1211  ;;  %v1590_v50 = vld [vmem:[#allocation2 + $0x88] sm:$0xff] }
 0x18c   : > { %1290 = vst.msk [vmem:[#allocation2 + $0x90] sm:$0xff] %vm1271_vm9, %v1212_v19  ;;  %v1180_v61 = vpop.permute.xlu0 %1179  ;;  %v1574_v49 = vld [vmem:[#allocation2 + $0x8] sm:$0xff]  ;;  %2210 = vmatmul.mubr.msk.f32.vlgmr.msra.gmra.mrb[0].mxu1 %vm1617_vm12, %v1590_v50 }
 0x18d   : > { %1274 = vst.msk [vmem:[#allocation2 + $0x10] sm:$0xff] %vm1271_vm9, %v1180_v61  ;;  %2186 = vmatmul.mubr.msk.f32.vlgmr.msra.gmra.mrb[0].mxu0 %vm1617_vm12, %v1574_v49  ;;  %1094 = vrot.lane.b32.xlu1 %v3061_v52, %s2396_s8 }
 0x18e   : > { %1062 = vrot.lane.b32.xlu0 %v4044_v20, %s2396_s8 }
 0x18f   : > { %v1214_v26 = vpop.permute.xlu1 %1213 }
 0x190   : > { %1291 = vst.msk [vmem:[#allocation2 + $0x98] sm:$0xff] %vm1271_vm9, %v1214_v26  ;;  %v1182_v18 = vpop.permute.xlu0 %1181 }
 0x191   : > { %1275 = vst.msk [vmem:[#allocation2 + $0x18] sm:$0xff] %vm1271_vm9, %v1182_v18  ;;  %1223 = vrot.lane.b32.xlu1 %v2691_v58, %s2397_s9  ;;  %v4046_v58 = vld [vmem:[#allocation14_spill] sm:$0xff] }
 0x192   : > { %1191 = vrot.lane.b32.xlu0 %v2578_v30, %s2397_s9  ;;  %v4045_v30 = vld [vmem:[#allocation28_spill] sm:$0xff] }
 0x193   : > { %v1347_v46 = vpop.permute.xlu1 %1346 }
 0x194   : > { %1425 = vst.msk [vmem:[#allocation2 + $0x90] sm:$0xff] %vm1406_vm10, %v1347_v46  ;;  %v1315_v0 = vpop.permute.xlu0 %1314 }
 0x195   : > { %1409 = vst.msk [vmem:[#allocation2 + $0x10] sm:$0xff] %vm1406_vm10, %v1315_v0  ;;  %1225 = vrot.lane.b32.xlu1 %v2688_v57, %s2397_s9  ;;  %v4056_v0 = vld [vmem:[#allocation35_spill] sm:$0xff] }
 0x196   : > { %1193 = vrot.lane.b32.xlu0 %v2575_v29, %s2397_s9 }
 0x197   : > { %v951_v52 = vpop.permute.xlu1 %950 }
 0x198   : > { %1027 = vst.msk [vmem:[#allocation2 + $0xa0] sm:$0xff] %vm1006_vm7, %v951_v52  ;;  %v919_v1 = vpop.permute.xlu0 %918 }
 0x199   : > { %1011 = vst.msk [vmem:[#allocation2 + $0x20] sm:$0xff] %vm1006_vm7, %v919_v1  ;;  %1358 = vrot.lane.b32.xlu1 %v4045_v30, %s2398_s10 }
 0x19a   : > { %1326 = vrot.lane.b32.xlu0 %v4046_v58, %s2398_s10 }
 0x19b   : > { %v1349_v16 = vpop.permute.xlu1 %1348 }
 0x19c   : > { %1426 = vst.msk [vmem:[#allocation2 + $0x98] sm:$0xff] %vm1406_vm10, %v1349_v16  ;;  %v1317_v45 = vpop.permute.xlu0 %1316 }
 0x19d   : > { %1410 = vst.msk [vmem:[#allocation2 + $0x18] sm:$0xff] %vm1406_vm10, %v1317_v45  ;;  %962 = vrot.lane.b32.xlu1 %v4045_v30, %s2395_s7  ;;  %v906_v45 = vrot.slane %v3193_v3, 1 }
 0x19e   : > { %930 = vrot.lane.b32.xlu0 %v4046_v58, %s2395_s7 }
 0x19f   : > { %v1481_v29 = vpop.permute.xlu1 %1480 }
 0x1a0   : > { %1559 = vst.msk [vmem:[#allocation2 + $0x90] sm:$0xff] %vm1540_vm11, %v1481_v29  ;;  %v1449_v57 = vpop.permute.xlu0 %1448  ;;  %v905_v29 = vrot.slane %v3196_v34, 1 }
 0x1a1   : > { %1543 = vst.msk [vmem:[#allocation2 + $0x10] sm:$0xff] %vm1540_vm11, %v1449_v57  ;;  %1360 = vrot.lane.b32.xlu1 %v4047_v59, %s2398_s10 }
 0x1a2   : > { %1328 = vrot.lane.b32.xlu0 %v4048_v2, %s2398_s10 }
 0x1a3   : > { %v953_v47 = vpop.permute.xlu1 %952 }
 0x1a4   : > { %1028 = vst.msk [vmem:[#allocation2 + $0xa8] sm:$0xff] %vm1006_vm7, %v953_v47  ;;  %v921_v8 = vpop.permute.xlu0 %920  ;;  %v268_v47 = vld [vmem:[%s2482_s30 + $0x190] sm:$0x3] }
 0x1a5   : > { %1012 = vst.msk [vmem:[#allocation2 + $0x28] sm:$0xff] %vm1006_vm7, %v921_v8  ;;  %1492 = vrot.lane.b32.xlu1 %v3081_v54, %s2399_s29 }
 0x1a6   : > { %1460 = vrot.lane.b32.xlu0 %v4049_v36, %s2399_s29 }
 0x1a7   : > { %v1085_v39 = vpop.permute.xlu1 %1084  ;;  %v1591_v12 = vld [vmem:[#allocation2 + $0x90] sm:$0xff] }
 0x1a8   : > { %1161 = vst.msk [vmem:[#allocation2 + $0xa0] sm:$0xff] %vm1140_vm8, %v1085_v39  ;;  %v1053_v21 = vpop.permute.xlu0 %1052  ;;  %v1575_v17 = vld [vmem:[#allocation2 + $0x10] sm:$0xff]  ;;  %2212 = vmatprep.mubr.msk.f32.mxu1 %vm1617_vm12, %v1591_v12 }
 0x1a9   : > { %1145 = vst.msk [vmem:[#allocation2 + $0x20] sm:$0xff] %vm1140_vm8, %v1053_v21  ;;  %2188 = vmatprep.mubr.msk.f32.mxu0 %vm1617_vm12, %v1575_v17  ;;  %964 = vrot.lane.b32.xlu1 %v4047_v59, %s2395_s7  ;;  %v907_v59 = vsel %vm353_vm1, %v905_v29, %v906_v45  ;;  %v1039_v21 = vrot.slane %v3196_v34, 2 }
 0x1aa   : > { %932 = vrot.lane.b32.xlu0 %v4048_v2, %s2395_s7 }
 0x1ab   : > { %v1483_v56 = vpop.permute.xlu1 %1482 }
 0x1ac   : > { %1560 = vst.msk [vmem:[#allocation2 + $0x98] sm:$0xff] %vm1540_vm11, %v1483_v56  ;;  %v1451_v28 = vpop.permute.xlu0 %1450 }
 0x1ad   : > { %1544 = vst.msk [vmem:[#allocation2 + $0x18] sm:$0xff] %vm1540_vm11, %v1451_v28  ;;  %1096 = vrot.lane.b32.xlu1 %v3081_v54, %s2396_s8 }
 0x1ae   : > { %1064 = vrot.lane.b32.xlu0 %v4049_v36, %s2396_s8  ;;  %v908_v36 = vrot.slane %v268_v47, 1 }
 0x1af   : > { %v1087_v11 = vpop.permute.xlu1 %1086 }
 0x1b0   : > { %1162 = vst.msk [vmem:[#allocation2 + $0xa8] sm:$0xff] %vm1140_vm8, %v1087_v11  ;;  %v1055_v44 = vpop.permute.xlu0 %1054  ;;  %v909_v17 = vsel %vm353_vm1, %v906_v45, %v908_v36  ;;  %v4058_v11 = vld [vmem:[#allocation17_spill] sm:$0xff] }
 0x1b1   : > { %1146 = vst.msk [vmem:[#allocation2 + $0x28] sm:$0xff] %vm1140_vm8, %v1055_v44  ;;  %1494 = vrot.lane.b32.xlu1 %v3076_v22, %s2399_s29 }
 0x1b2   : > { %1462 = vrot.lane.b32.xlu0 %v4050_v10, %s2399_s29 }
 0x1b3   : > { %v1216_v24 = vpop.permute.xlu1 %1215  ;;  %v1592_v55 = vld [vmem:[#allocation2 + $0x98] sm:$0xff] }
 0x1b4   : > { %1292 = vst.msk [vmem:[#allocation2 + $0xa0] sm:$0xff] %vm1271_vm9, %v1216_v24  ;;  %v1184_v54 = vpop.permute.xlu0 %1183  ;;  %v1576_v33 = vld [vmem:[#allocation2 + $0x18] sm:$0xff]  ;;  %2213 = vmatmul.mubr.msk.f32.gmra.mrb[2].mxu1 %vm1617_vm12, %v1592_v55 }
 0x1b5   : > { %1276 = vst.msk [vmem:[#allocation2 + $0x20] sm:$0xff] %vm1271_vm9, %v1184_v54  ;;  %2189 = vmatmul.mubr.msk.f32.gmra.mrb[2].mxu0 %vm1617_vm12, %v1576_v33  ;;  %1098 = vrot.lane.b32.xlu1 %v3076_v22, %s2396_s8 }
 0x1b6   : > { %1066 = vrot.lane.b32.xlu0 %v4050_v10, %s2396_s8  ;;  %v4059_v10 = vld [vmem:[#allocation38_spill] sm:$0xff] }
 0x1b7   : > { %v1218_v38 = vpop.permute.xlu1 %1217 }
 0x1b8   : > { %1293 = vst.msk [vmem:[#allocation2 + $0xa8] sm:$0xff] %vm1271_vm9, %v1218_v38  ;;  %v1186_v43 = vpop.permute.xlu0 %1185  ;;  %v1042_v38 = vrot.slane %v268_v47, 2 }
 0x1b9   : > { %1277 = vst.msk [vmem:[#allocation2 + $0x28] sm:$0xff] %vm1271_vm9, %v1186_v43  ;;  %1227 = vrot.lane.b32.xlu1 %v2706_v63, %s2397_s9  ;;  %v4052_v63 = vld [vmem:[#allocation16_spill] sm:$0xff] }
 0x1ba   : > { %1195 = vrot.lane.b32.xlu0 %v2588_v32, %s2397_s9  ;;  %v4051_v32 = vld [vmem:[#allocation30_spill] sm:$0xff] }
 0x1bb   : > { %v1351_v25 = vpop.permute.xlu1 %1350 }
 0x1bc   : > { %1427 = vst.msk [vmem:[#allocation2 + $0xa0] sm:$0xff] %vm1406_vm10, %v1351_v25  ;;  %v1319_v27 = vpop.permute.xlu0 %1318 }
 0x1bd   : > { %1411 = vst.msk [vmem:[#allocation2 + $0x20] sm:$0xff] %vm1406_vm10, %v1319_v27  ;;  %1229 = vrot.lane.b32.xlu1 %v2703_v62, %s2397_s9 }
 0x1be   : > { %1197 = vrot.lane.b32.xlu0 %v2585_v31, %s2397_s9 }
 0x1bf   : > { %v955_v22 = vpop.permute.xlu1 %954 }
 0x1c0   : > { %1029 = vst.msk [vmem:[#allocation2 + $0xb0] sm:$0xff] %vm1006_vm7, %v955_v22  ;;  %v923_v35 = vpop.permute.xlu0 %922 }
 0x1c1   : > { %1013 = vst.msk [vmem:[#allocation2 + $0x30] sm:$0xff] %vm1006_vm7, %v923_v35  ;;  %1362 = vrot.lane.b32.xlu1 %v4051_v32, %s2398_s10 }
 0x1c2   : > { %1330 = vrot.lane.b32.xlu0 %v4052_v63, %s2398_s10 }
 0x1c3   : > { %v1353_v15 = vpop.permute.xlu1 %1352 }
 0x1c4   : > { %1428 = vst.msk [vmem:[#allocation2 + $0xa8] sm:$0xff] %vm1406_vm10, %v1353_v15  ;;  %v1321_v14 = vpop.permute.xlu0 %1320 }
 0x1c5   : > { %1412 = vst.msk [vmem:[#allocation2 + $0x28] sm:$0xff] %vm1406_vm10, %v1321_v14  ;;  %966 = vrot.lane.b32.xlu1 %v4051_v32, %s2395_s7  ;;  %v4060_v32 = vld [vmem:[#allocation37_spill] sm:$0xff] }
 0x1c6   : > { %934 = vrot.lane.b32.xlu0 %v4052_v63, %s2395_s7 }
 0x1c7   : > { %v1485_v31 = vpop.permute.xlu1 %1484 }
 0x1c8   : > { %1561 = vst.msk [vmem:[#allocation2 + $0xa0] sm:$0xff] %vm1540_vm11, %v1485_v31  ;;  %v1453_v62 = vpop.permute.xlu0 %1452 }
 0x1c9   : > { %1545 = vst.msk [vmem:[#allocation2 + $0x20] sm:$0xff] %vm1540_vm11, %v1453_v62  ;;  %1364 = vrot.lane.b32.xlu1 %v4053_v5, %s2398_s10  ;;  %v269_v62 = vld [vmem:[%s2482_s30 + $0x198] sm:$0xff] }
 0x1ca   : > { %1332 = vrot.lane.b32.xlu0 %v4054_v4, %s2398_s10 }
 0x1cb   : > { %v957_v23 = vpop.permute.xlu1 %956 }
 0x1cc   : > { %1030 = vst.msk [vmem:[#allocation2 + $0xb8] sm:$0xff] %vm1006_vm7, %v957_v23  ;;  %v925_v51 = vpop.permute.xlu0 %924 }
 0x1cd   : > { %1014 = vst.msk [vmem:[#allocation2 + $0x38] sm:$0xff] %vm1006_vm7, %v925_v51  ;;  %1496 = vrot.lane.b32.xlu1 %v3094_v48, %s2399_s29  ;;  %v1305_v51 = vrot.slane %v269_v62, 1 }
 0x1ce   : > { %1464 = vrot.lane.b32.xlu0 %v4055_v13, %s2399_s29 }
 0x1cf   : > { %v1089_v20 = vpop.permute.xlu1 %1088  ;;  %v1593_v19 = vld [vmem:[#allocation2 + $0xa0] sm:$0xff] }
 0x1d0   : > { %1163 = vst.msk [vmem:[#allocation2 + $0xb0] sm:$0xff] %vm1140_vm8, %v1089_v20  ;;  %v1057_v50 = vpop.permute.xlu0 %1056  ;;  %v1577_v61 = vld [vmem:[#allocation2 + $0x20] sm:$0xff]  ;;  %2215 = vmatprep.mubr.msk.f32.mxu1 %vm1617_vm12, %v1593_v19  ;;  %v271_v19 = vld [vmem:[%s2482_s30 + $0x1a8] sm:$0x3] }
 0x1d1   : > { %1147 = vst.msk [vmem:[#allocation2 + $0x30] sm:$0xff] %vm1140_vm8, %v1057_v50  ;;  %2191 = vmatprep.mubr.msk.f32.mxu0 %vm1617_vm12, %v1577_v61  ;;  %968 = vrot.lane.b32.xlu1 %v4053_v5, %s2395_s7 }
 0x1d2   : > { %936 = vrot.lane.b32.xlu0 %v4054_v4, %s2395_s7  ;;  %v270_v4 = vld [vmem:[%s2482_s30 + $0x1a0] sm:$0xff]  ;;  %s199_s30 = sand.u32 1, %s2374_s13  }
 0x1d3   : > { %v1487_v49 = vpop.permute.xlu1 %1486  ;;  %s3876_s15 = scalar_lea.sflag [#allocation4], %s199_s30 }
 0x1d4   : > { %1562 = vst.msk [vmem:[#allocation2 + $0xa8] sm:$0xff] %vm1540_vm11, %v1487_v49  ;;  %v1455_v26 = vpop.permute.xlu0 %1454  ;;  %v1308_v49 = vrot.slane %v271_v19, 1 }
 0x1d5   : > { %1546 = vst.msk [vmem:[#allocation2 + $0x28] sm:$0xff] %vm1540_vm11, %v1455_v26  ;;  %1100 = vrot.lane.b32.xlu1 %v3094_v48, %s2396_s8 }
 0x1d6   : > { %1068 = vrot.lane.b32.xlu0 %v4055_v13, %s2396_s8  ;;  %v1306_v13 = vrot.slane %v270_v4, 1 }
 0x1d7   : > { %v1091_v18 = vpop.permute.xlu1 %1090 }
 0x1d8   : > { %1164 = vst.msk [vmem:[#allocation2 + $0xb8] sm:$0xff] %vm1140_vm8, %v1091_v18  ;;  %v1059_v46 = vpop.permute.xlu0 %1058  ;;  %v1307_v61 = vsel %vm353_vm1, %v1305_v51, %v1306_v13  ;;  %v1439_v18 = vrot.slane %v269_v62, 2 }
 0x1d9   : > { %1148 = vst.msk [vmem:[#allocation2 + $0x38] sm:$0xff] %vm1140_vm8, %v1059_v46  ;;  %1498 = vrot.lane.b32.xlu1 %v3091_v6, %s2399_s29  ;;  %v1440_v46 = vrot.slane %v270_v4, 2 }
 0x1da   : > { %1466 = vrot.lane.b32.xlu0 %v4056_v0, %s2399_s29 }
 0x1db   : > { %v1220_v52 = vpop.permute.xlu1 %1219  ;;  %v1594_v1 = vld [vmem:[#allocation2 + $0xa8] sm:$0xff] }
 0x1dc   : > { %1294 = vst.msk [vmem:[#allocation2 + $0xb0] sm:$0xff] %vm1271_vm9, %v1220_v52  ;;  %v1188_v48 = vpop.permute.xlu0 %1187  ;;  %v1578_v30 = vld [vmem:[#allocation2 + $0x28] sm:$0xff]  ;;  %2216 = vmatmul.mubr.msk.f32.gmra.mrb[4].mxu1 %vm1617_vm12, %v1594_v1  ;;  %v1441_v1 = vsel %vm563_vm2, %v1439_v18, %v1440_v46 }
 0x1dd   : > { %1278 = vst.msk [vmem:[#allocation2 + $0x30] sm:$0xff] %vm1271_vm9, %v1188_v48  ;;  %2192 = vmatmul.mubr.msk.f32.gmra.mrb[4].mxu0 %vm1617_vm12, %v1578_v30  ;;  %1102 = vrot.lane.b32.xlu1 %v3091_v6, %s2396_s8  ;;  %v1442_v48 = vrot.slane %v271_v19, 2 }
 0x1de   : > { %1070 = vrot.lane.b32.xlu0 %v4056_v0, %s2396_s8  ;;  %v1309_v0 = vsel %vm353_vm1, %v1306_v13, %v1308_v49 }
 0x1df   : > { %v1222_v58 = vpop.permute.xlu1 %1221 }
 0x1e0   : > { %1295 = vst.msk [vmem:[#allocation2 + $0xb8] sm:$0xff] %vm1271_vm9, %v1222_v58  ;;  %v1190_v16 = vpop.permute.xlu0 %1189  ;;  %v1443_v58 = vsel %vm563_vm2, %v1440_v46, %v1442_v48 }
 0x1e1   : > { %1279 = vst.msk [vmem:[#allocation2 + $0x38] sm:$0xff] %vm1271_vm9, %v1190_v16  ;;  %1231 = vrot.lane.b32.xlu1 %v3196_v34, %s2397_s9 }
 0x1e2   : > { %1199 = vrot.lane.b32.xlu0 %v2615_v40, %s2397_s9  ;;  %v4057_v40 = vld [vmem:[#allocation18_spill] sm:$0xff] }
 0x1e3   : > { %v1355_v6 = vpop.permute.xlu1 %1354 }
 0x1e4   : > { %1429 = vst.msk [vmem:[#allocation2 + $0xb0] sm:$0xff] %vm1406_vm10, %v1355_v6  ;;  %v1323_v57 = vpop.permute.xlu0 %1322 }
 0x1e5   : > { %1413 = vst.msk [vmem:[#allocation2 + $0x30] sm:$0xff] %vm1406_vm10, %v1323_v57  ;;  %1233 = vrot.lane.b32.xlu1 %v3193_v3, %s2397_s9 }
 0x1e6   : > { %1201 = vrot.lane.b32.xlu0 %v2604_v37, %s2397_s9  ;;  %v1040_v37 = vrot.slane %v3193_v3, 2 }
 0x1e7   : > { %v959_v2 = vpop.permute.xlu1 %958 }
 0x1e8   : > { %1031 = vst.msk [vmem:[#allocation2 + $0xc0] sm:$0xff] %vm1006_vm7, %v959_v2  ;;  %v927_v8 = vpop.permute.xlu0 %926  ;;  %v1041_v3 = vsel %vm563_vm2, %v1039_v21, %v1040_v37  ;;  %v1043_v27 = vsel %vm563_vm2, %v1040_v37, %v1042_v38 }
 0x1e9   : > { %1015 = vst.msk [vmem:[#allocation2 + $0x40] sm:$0xff] %vm1006_vm7, %v927_v8  ;;  %1366 = vrot.lane.b32.xlu1 %v907_v59, %s2398_s10 }
 0x1ea   : > { %1334 = vrot.lane.b32.xlu0 %v4057_v40, %s2398_s10 }
 0x1eb   : > { %v1357_v39 = vpop.permute.xlu1 %1356 }
 0x1ec   : > { %1430 = vst.msk [vmem:[#allocation2 + $0xb8] sm:$0xff] %vm1406_vm10, %v1357_v39  ;;  %v1325_v12 = vpop.permute.xlu0 %1324 }
 0x1ed   : > { %1414 = vst.msk [vmem:[#allocation2 + $0x38] sm:$0xff] %vm1406_vm10, %v1325_v12  ;;  %970 = vrot.lane.b32.xlu1 %v907_v59, %s2395_s7 }
 0x1ee   : > { %938 = vrot.lane.b32.xlu0 %v4057_v40, %s2395_s7 }
 0x1ef   : > { %v1489_v56 = vpop.permute.xlu1 %1488 }
 0x1f0   : > { %1563 = vst.msk [vmem:[#allocation2 + $0xb0] sm:$0xff] %vm1540_vm11, %v1489_v56  ;;  %v1457_v28 = vpop.permute.xlu0 %1456 }
 0x1f1   : > { %1547 = vst.msk [vmem:[#allocation2 + $0x30] sm:$0xff] %vm1540_vm11, %v1457_v28  ;;  %1368 = vrot.lane.b32.xlu1 %v909_v17, %s2398_s10 }
 0x1f2   : > { %1336 = vrot.lane.b32.xlu0 %v4058_v11, %s2398_s10 }
 0x1f3   : > { %v961_v44 = vpop.permute.xlu1 %960 }
 0x1f4   : > { %1032 = vst.msk [vmem:[#allocation2 + $0xc8] sm:$0xff] %vm1006_vm7, %v961_v44  ;;  %v929_v34 = vpop.permute.xlu0 %928 }
 0x1f5   : > { %1016 = vst.msk [vmem:[#allocation2 + $0x48] sm:$0xff] %vm1006_vm7, %v929_v34  ;;  %1500 = vrot.lane.b32.xlu1 %v1041_v3, %s2399_s29 }
 0x1f6   : > { %1468 = vrot.lane.b32.xlu0 %v4059_v10, %s2399_s29 }
 0x1f7   : > { %v1093_v24 = vpop.permute.xlu1 %1092  ;;  %v1595_v55 = vld [vmem:[#allocation2 + $0xb0] sm:$0xff] }
 0x1f8   : > { %1165 = vst.msk [vmem:[#allocation2 + $0xc0] sm:$0xff] %vm1140_vm8, %v1093_v24  ;;  %v1061_v54 = vpop.permute.xlu0 %1060  ;;  %v1579_v33 = vld [vmem:[#allocation2 + $0x30] sm:$0xff]  ;;  %2218 = vmatprep.mubr.msk.f32.mxu1 %vm1617_vm12, %v1595_v55 }
 0x1f9   : > { %1149 = vst.msk [vmem:[#allocation2 + $0x40] sm:$0xff] %vm1140_vm8, %v1061_v54  ;;  %2194 = vmatprep.mubr.msk.f32.mxu0 %vm1617_vm12, %v1579_v33  ;;  %972 = vrot.lane.b32.xlu1 %v909_v17, %s2395_s7 }
 0x1fa   : > { %940 = vrot.lane.b32.xlu0 %v4058_v11, %s2395_s7  ;;  %s2096_s7 = sshll.u32 %s199_s30, 8 }
 0x1fb   : > { %v1491_v43 = vpop.permute.xlu1 %1490 }
 0x1fc   : > { %1564 = vst.msk [vmem:[#allocation2 + $0xb8] sm:$0xff] %vm1540_vm11, %v1491_v43  ;;  %v1459_v25 = vpop.permute.xlu0 %1458 }
 0x1fd   : > { %1548 = vst.msk [vmem:[#allocation2 + $0x38] sm:$0xff] %vm1540_vm11, %v1459_v25  ;;  %1104 = vrot.lane.b32.xlu1 %v1041_v3, %s2396_s8 }
 0x1fe   : > { %1072 = vrot.lane.b32.xlu0 %v4059_v10, %s2396_s8 }
 0x1ff   : > { %v1095_v22 = vpop.permute.xlu1 %1094 }
 0x200   : > { %1166 = vst.msk [vmem:[#allocation2 + $0xc8] sm:$0xff] %vm1140_vm8, %v1095_v22  ;;  %v1063_v35 = vpop.permute.xlu0 %1062 }
 0x201   : > { %1150 = vst.msk [vmem:[#allocation2 + $0x48] sm:$0xff] %vm1140_vm8, %v1063_v35  ;;  %1502 = vrot.lane.b32.xlu1 %v1043_v27, %s2399_s29 }
 0x202   : > { %1470 = vrot.lane.b32.xlu0 %v4060_v32, %s2399_s29 }
 0x203   : > { %v1224_v63 = vpop.permute.xlu1 %1223  ;;  %v1596_v15 = vld [vmem:[#allocation2 + $0xb8] sm:$0xff] }
 0x204   : > { %1296 = vst.msk [vmem:[#allocation2 + $0xc0] sm:$0xff] %vm1271_vm9, %v1224_v63  ;;  %v1192_v14 = vpop.permute.xlu0 %1191  ;;  %v1580_v31 = vld [vmem:[#allocation2 + $0x38] sm:$0xff]  ;;  %2219 = vmatmul.mubr.msk.f32.gmra.mrb[6].mxu1 %vm1617_vm12, %v1596_v15 }
 0x205   : > { %1280 = vst.msk [vmem:[#allocation2 + $0x40] sm:$0xff] %vm1271_vm9, %v1192_v14  ;;  %2195 = vmatmul.mubr.msk.f32.gmra.mrb[6].mxu0 %vm1617_vm12, %v1580_v31  ;;  %1106 = vrot.lane.b32.xlu1 %v1043_v27, %s2396_s8 }
 0x206   : > { %1074 = vrot.lane.b32.xlu0 %v4060_v32, %s2396_s8 }
 0x207   : > { %v1226_v5 = vpop.permute.xlu1 %1225 }
 0x208   : > { %1297 = vst.msk [vmem:[#allocation2 + $0xc8] sm:$0xff] %vm1271_vm9, %v1226_v5  ;;  %v1194_v23 = vpop.permute.xlu0 %1193  ;;  %v3763_v5 = vld [vmem:[%s3925_s2] ss:$0 sm:$0xff] }
 0x209   : > { %1281 = vst.msk [vmem:[#allocation2 + $0x48] sm:$0xff] %vm1271_vm9, %v1194_v23  ;;  %1235 = vrot.lane.b32.xlu1 %v269_v62, %s2397_s9 }
 0x20a   : > { %1203 = vrot.lane.b32.xlu0 %v2621_v42, %s2397_s9 }
 0x20b   : > { %v1359_v20 = vpop.permute.xlu1 %1358 }
 0x20c   : > { %1431 = vst.msk [vmem:[#allocation2 + $0xc0] sm:$0xff] %vm1406_vm10, %v1359_v20  ;;  %v1327_v50 = vpop.permute.xlu0 %1326 }
 0x20d   : > { %1415 = vst.msk [vmem:[#allocation2 + $0x40] sm:$0xff] %vm1406_vm10, %v1327_v50  ;;  %1237 = vrot.lane.b32.xlu1 %v270_v4, %s2397_s9 }
 0x20e   : > { %1205 = vrot.lane.b32.xlu0 %v2618_v41, %s2397_s9 }
 0x20f   : > { %v963_v26 = vpop.permute.xlu1 %962 }
 0x210   : > { %1033 = vst.msk [vmem:[#allocation2 + $0xd0] sm:$0xff] %vm1006_vm7, %v963_v26  ;;  %v931_v42 = vpop.permute.xlu0 %930 }
 0x211   : > { %1017 = vst.msk [vmem:[#allocation2 + $0x50] sm:$0xff] %vm1006_vm7, %v931_v42  ;;  %1370 = vrot.lane.b32.xlu1 %v1307_v61, %s2398_s10 }
 0x212   : > { %1338 = vrot.lane.b32.xlu0 %v2797_v53, %s2398_s10 }
 0x213   : > { %v1361_v52 = vpop.permute.xlu1 %1360 }
 0x214   : > { %1432 = vst.msk [vmem:[#allocation2 + $0xc8] sm:$0xff] %vm1406_vm10, %v1361_v52  ;;  %v1329_v41 = vpop.permute.xlu0 %1328 }
 0x215   : > { %1416 = vst.msk [vmem:[#allocation2 + $0x48] sm:$0xff] %vm1406_vm10, %v1329_v41  ;;  %1372 = vrot.lane.b32.xlu1 %v1309_v0, %s2398_s10 }
 0x216   : > { %1340 = vrot.lane.b32.xlu0 %v2792_v60, %s2398_s10  ;;  %s3769_s10 = scalar_lea.vmem [#allocation3], %s2096_s7 }
 0x217   : > { %v1493_v30 = vpop.permute.xlu1 %1492  ;;  %s1990_s18 = sshll.u32 %s3769_s10, 4  ;;  %s3869_s18 = int_to_ptr.vmem [resolvable:$true] %s1990_s18 }
 0x218   : > { %1565 = vst.msk [vmem:[#allocation2 + $0xc0] sm:$0xff] %vm1540_vm11, %v1493_v30  ;;  %v1461_v53 = vpop.permute.xlu0 %1460  ;;  %s2312_s26 = scalar_lea.vmem %s3869_s18, 4096  ;;  %p2319_p1 = scmp.lt.s32.totalorder %s3869_s18, %s2317_s28 }
 0x219   : > { %1549 = vst.msk [vmem:[#allocation2 + $0x40] sm:$0xff] %vm1540_vm11, %v1461_v53  ;;  %1504 = vrot.lane.b32.xlu1 %v1441_v1, %s2399_s29  ;;  %p2313_p12 = scmp.ne.s32.totalorder %s3869_s18, %s2312_s26 }
 0x21a   : > { %1472 = vrot.lane.b32.xlu0 %v3014_v9, %s2399_s29 }
 0x21b   : > { %v965_v16 = vpop.permute.xlu1 %964  ;;  %p2314_p13 = pnand %p2313_p12, %p2462_p4 }
 0x21c   : > { %1034 = vst.msk [vmem:[#allocation2 + $0xd8] sm:$0xff] %vm1006_vm7, %v965_v16  ;;  %v933_v60 = vpop.permute.xlu0 %932 }
 0x21d   : > { %1018 = vst.msk [vmem:[#allocation2 + $0x58] sm:$0xff] %vm1006_vm7, %v933_v60  ;;  %1506 = vrot.lane.b32.xlu1 %v1443_v58, %s2399_s29  ;;  %p2315_p0 = pneg %p2314_p13 }
 0x21e   : > { %1474 = vrot.lane.b32.xlu0 %v3009_v7, %s2399_s29  ;;  %s2318_s29 = scalar_lea.vmem %s2317_s28, 8192 }
 0x21f   : > { %v1097_v45 = vpop.permute.xlu1 %1096  ;;  %v1597_v29 = vld [vmem:[#allocation2 + $0xc0] sm:$0xff]  ;;  %p2320_p2 = scmp.lt.s32.totalorder %s2318_s29, %s2312_s26 }
 0x220   : > { %1167 = vst.msk [vmem:[#allocation2 + $0xd0] sm:$0xff] %vm1140_vm8, %v1097_v45  ;;  %v1065_v6 = vpop.permute.xlu0 %1064  ;;  %v1581_v57 = vld [vmem:[#allocation2 + $0x40] sm:$0xff]  ;;  %2221 = vmatprep.mubr.msk.f32.mxu1 %vm1617_vm12, %v1597_v29 }
 0x221   : > { %1151 = vst.msk [vmem:[#allocation2 + $0x50] sm:$0xff] %vm1140_vm8, %v1065_v6  ;;  %2197 = vmatprep.mubr.msk.f32.mxu0 %vm1617_vm12, %v1581_v57  ;;  %p2321_p3 = por %p2320_p2, %p2319_p1 }
 0x223   : > { %v1495_v9 = vpop.permute.xlu1 %1494  ;;  %p2322_p5 = pnand %p2321_p3, %p2315_p0 }
 0x224   : > { %1566 = vst.msk [vmem:[#allocation2 + $0xc8] sm:$0xff] %vm1540_vm11, %v1495_v9  ;;  %v1463_v59 = vpop.permute.xlu0 %1462 }
 0x225   : > { %1550 = vst.msk [vmem:[#allocation2 + $0x48] sm:$0xff] %vm1540_vm11, %v1463_v59 }
 0x227   : > { %v1099_v2 = vpop.permute.xlu1 %1098 }
 0x228   : > { %1168 = vst.msk [vmem:[#allocation2 + $0xd8] sm:$0xff] %vm1140_vm8, %v1099_v2  ;;  %v1067_v7 = vpop.permute.xlu0 %1066 }
 0x229   : > { %1152 = vst.msk [vmem:[#allocation2 + $0x58] sm:$0xff] %vm1140_vm8, %v1067_v7 }
 0x22b   : > { %v1228_v47 = vpop.permute.xlu1 %1227  ;;  %v1598_v8 = vld [vmem:[#allocation2 + $0xc8] sm:$0xff] }
 0x22c   : > { %1298 = vst.msk [vmem:[#allocation2 + $0xd0] sm:$0xff] %vm1271_vm9, %v1228_v47  ;;  %v1196_v40 = vpop.permute.xlu0 %1195  ;;  %v1582_v36 = vld [vmem:[#allocation2 + $0x48] sm:$0xff]  ;;  %2222 = vmatmul.mubr.msk.f32.gmra.mrb[8].mxu1 %vm1617_vm12, %v1598_v8 }
 0x22d   : > { %1282 = vst.msk [vmem:[#allocation2 + $0x50] sm:$0xff] %vm1271_vm9, %v1196_v40  ;;  %2198 = vmatmul.mubr.msk.f32.gmra.mrb[8].mxu0 %vm1617_vm12, %v1582_v36 }
 0x22f   : > { %v1230_v39 = vpop.permute.xlu1 %1229 }
 0x230   : > { %1299 = vst.msk [vmem:[#allocation2 + $0xd8] sm:$0xff] %vm1271_vm9, %v1230_v39  ;;  %v1198_v12 = vpop.permute.xlu0 %1197 }
 0x231   : > { %1283 = vst.msk [vmem:[#allocation2 + $0x58] sm:$0xff] %vm1271_vm9, %v1198_v12 }
 0x233   : > { %v1363_v37 = vpop.permute.xlu1 %1362 }
 0x234   : > { %1433 = vst.msk [vmem:[#allocation2 + $0xd0] sm:$0xff] %vm1406_vm10, %v1363_v37  ;;  %v1331_v21 = vpop.permute.xlu0 %1330 }
 0x235   : > { %1417 = vst.msk [vmem:[#allocation2 + $0x50] sm:$0xff] %vm1406_vm10, %v1331_v21 }
 0x237   : > { %v967_v17 = vpop.permute.xlu1 %966 }
 0x238   : > { %1035 = vst.msk [vmem:[#allocation2 + $0xe0] sm:$0xff] %vm1006_vm7, %v967_v17  ;;  %v935_v56 = vpop.permute.xlu0 %934 }
 0x239   : > { %1019 = vst.msk [vmem:[#allocation2 + $0x60] sm:$0xff] %vm1006_vm7, %v935_v56 }
 0x23b   : > { %v1365_v28 = vpop.permute.xlu1 %1364 }
 0x23c   : > { %1434 = vst.msk [vmem:[#allocation2 + $0xd8] sm:$0xff] %vm1406_vm10, %v1365_v28  ;;  %v1333_v11 = vpop.permute.xlu0 %1332 }
 0x23d   : > { %1418 = vst.msk [vmem:[#allocation2 + $0x58] sm:$0xff] %vm1406_vm10, %v1333_v11 }
 0x23f   : > { %v1497_v3 = vpop.permute.xlu1 %1496 }
 0x240   : > { %1567 = vst.msk [vmem:[#allocation2 + $0xd0] sm:$0xff] %vm1540_vm11, %v1497_v3  ;;  %v1465_v44 = vpop.permute.xlu0 %1464 }
 0x241   : > { %1551 = vst.msk [vmem:[#allocation2 + $0x50] sm:$0xff] %vm1540_vm11, %v1465_v44 }
 0x243   : > { %v969_v34 = vpop.permute.xlu1 %968 }
 0x244   : > { %1036 = vst.msk [vmem:[#allocation2 + $0xe8] sm:$0xff] %vm1006_vm7, %v969_v34  ;;  %v937_v10 = vpop.permute.xlu0 %936 }
 0x245   : > { %1020 = vst.msk [vmem:[#allocation2 + $0x68] sm:$0xff] %vm1006_vm7, %v937_v10 }
 0x247   : > { %v1101_v24 = vpop.permute.xlu1 %1100  ;;  %v1599_v55 = vld [vmem:[#allocation2 + $0xd0] sm:$0xff] }
 0x248   : > { %1169 = vst.msk [vmem:[#allocation2 + $0xe0] sm:$0xff] %vm1140_vm8, %v1101_v24  ;;  %v1069_v54 = vpop.permute.xlu0 %1068  ;;  %v1583_v33 = vld [vmem:[#allocation2 + $0x50] sm:$0xff]  ;;  %2224 = vmatprep.mubr.msk.f32.mxu1 %vm1617_vm12, %v1599_v55 }
 0x249   : > { %1153 = vst.msk [vmem:[#allocation2 + $0x60] sm:$0xff] %vm1140_vm8, %v1069_v54  ;;  %2200 = vmatprep.mubr.msk.f32.mxu0 %vm1617_vm12, %v1583_v33 }
 0x24b   : > { %v1499_v38 = vpop.permute.xlu1 %1498 }
 0x24c   : > { %1568 = vst.msk [vmem:[#allocation2 + $0xd8] sm:$0xff] %vm1540_vm11, %v1499_v38  ;;  %v1467_v43 = vpop.permute.xlu0 %1466 }
 0x24d   : > { %1552 = vst.msk [vmem:[#allocation2 + $0x58] sm:$0xff] %vm1540_vm11, %v1467_v43 }
 0x24f   : > { %v1103_v25 = vpop.permute.xlu1 %1102 }
 0x250   : > { %1170 = vst.msk [vmem:[#allocation2 + $0xe8] sm:$0xff] %vm1140_vm8, %v1103_v25  ;;  %v1071_v27 = vpop.permute.xlu0 %1070 }
 0x251   : > { %1154 = vst.msk [vmem:[#allocation2 + $0x68] sm:$0xff] %vm1140_vm8, %v1071_v27 }
 0x253   : > { %v1232_v22 = vpop.permute.xlu1 %1231  ;;  %v1600_v35 = vld [vmem:[#allocation2 + $0xd8] sm:$0xff] }
 0x254   : > { %1300 = vst.msk [vmem:[#allocation2 + $0xe0] sm:$0xff] %vm1271_vm9, %v1232_v22  ;;  %v1200_v32 = vpop.permute.xlu0 %1199  ;;  %v1584_v63 = vld [vmem:[#allocation2 + $0x58] sm:$0xff]  ;;  %2225 = vmatmul.mubr.msk.f32.gmra.mrb[10].mxu1 %vm1617_vm12, %v1600_v35 }
 0x255   : > { %1284 = vst.msk [vmem:[#allocation2 + $0x60] sm:$0xff] %vm1271_vm9, %v1200_v32  ;;  %2201 = vmatmul.mubr.msk.f32.gmra.mrb[10].mxu0 %vm1617_vm12, %v1584_v63 }
 0x257   : > { %v1234_v15 = vpop.permute.xlu1 %1233 }
 0x258   : > { %1301 = vst.msk [vmem:[#allocation2 + $0xe8] sm:$0xff] %vm1271_vm9, %v1234_v15  ;;  %v1202_v14 = vpop.permute.xlu0 %1201 }
 0x259   : > { %1285 = vst.msk [vmem:[#allocation2 + $0x68] sm:$0xff] %vm1271_vm9, %v1202_v14 }
 0x25b   : > { %v1367_v31 = vpop.permute.xlu1 %1366 }
 0x25c   : > { %1435 = vst.msk [vmem:[#allocation2 + $0xe0] sm:$0xff] %vm1406_vm10, %v1367_v31  ;;  %v1335_v62 = vpop.permute.xlu0 %1334 }
 0x25d   : > { %1419 = vst.msk [vmem:[#allocation2 + $0x60] sm:$0xff] %vm1406_vm10, %v1335_v62 }
 0x25f   : > { %v971_v4 = vpop.permute.xlu1 %970  ;;  %v2211_v23 = vpop.f32.mrb[0].mxu1 }
 0x260   : > { %1037 = vst.msk [vmem:[#allocation2 + $0xf0] sm:$0xff] %vm1006_vm7, %v971_v4  ;;  %v1870_v51 = vadd.f32 %v2211_v23, %v3763_v5  ;;  %v939_v13 = vpop.permute.xlu0 %938  ;;  %v2187_v20 = vpop.f32.mrb[0].mxu0 }
 0x261   : > { %1021 = vst.msk [vmem:[#allocation2 + $0x70] sm:$0xff] %vm1006_vm7, %v939_v13  ;;  %v1790_v19 = vadd.f32 %v2187_v20, %v3763_v5  ;;  %v1784_v50 = vpop.f32.mrb[1].mxu0  ;;  %v1864_v61 = vpop.f32.mrb[1].mxu1 }
 0x262   : > { %1960 = vst [vmem:[%s3769_s10 + $0x88] sm:$0xff] %v1870_v51  ;;  %v1785_v49 = vadd.f32 %v3763_v5, %v1784_v50  ;;  %v1865_v26 = vadd.f32 %v3763_v5, %v1864_v61 }
 0x263   : > { %1944 = vst [vmem:[%s3769_s10 + $0x8] sm:$0xff] %v1790_v19  ;;  %v1369_v42 = vpop.permute.xlu1 %1368 }
 0x264   : > { %1943 = vst [vmem:[%s3769_s10] sm:$0xff] %v1785_v49  ;;  %1959 = vst [vmem:[%s3769_s10 + $0x80] sm:$0xff] %v1865_v26  ;;  %v1337_v18 = vpop.permute.xlu0 %1336 }
 0x265   : > { %1436 = vst.msk [vmem:[#allocation2 + $0xe8] sm:$0xff] %vm1406_vm10, %v1369_v42  ;;  %1420 = vst.msk [vmem:[#allocation2 + $0x68] sm:$0xff] %vm1406_vm10, %v1337_v18 }
 0x267   : > { %v1501_v46 = vpop.permute.xlu1 %1500 }
 0x268   : > { %1569 = vst.msk [vmem:[#allocation2 + $0xe0] sm:$0xff] %vm1540_vm11, %v1501_v46  ;;  %v1469_v0 = vpop.permute.xlu0 %1468 }
 0x269   : > { %1553 = vst.msk [vmem:[#allocation2 + $0x60] sm:$0xff] %vm1540_vm11, %v1469_v0 }
 0x26b   : > { %v973_v52 = vpop.permute.xlu1 %972 }
 0x26c   : > { %1038 = vst.msk [vmem:[#allocation2 + $0xf8] sm:$0xff] %vm1006_vm7, %v973_v52  ;;  %v941_v41 = vpop.permute.xlu0 %940 }
 0x26d   : > { %1022 = vst.msk [vmem:[#allocation2 + $0x78] sm:$0xff] %vm1006_vm7, %v941_v41 }
 0x26f   : > { %v1105_v1 = vpop.permute.xlu1 %1104  ;;  %v1601_v48 = vld [vmem:[#allocation2 + $0xe0] sm:$0xff] }
 0x270   : > { %1171 = vst.msk [vmem:[#allocation2 + $0xf0] sm:$0xff] %vm1140_vm8, %v1105_v1  ;;  %v1073_v30 = vpop.permute.xlu0 %1072  ;;  %v1585_v53 = vld [vmem:[#allocation2 + $0x60] sm:$0xff]  ;;  %2227 = vmatprep.mubr.msk.f32.mxu1 %vm1617_vm12, %v1601_v48 }
 0x271   : > { %1155 = vst.msk [vmem:[#allocation2 + $0x70] sm:$0xff] %vm1140_vm8, %v1073_v30  ;;  %2203 = vmatprep.mubr.msk.f32.mxu0 %vm1617_vm12, %v1585_v53 }
 0x273   : > { %v1503_v58 = vpop.permute.xlu1 %1502 }
 0x274   : > { %1570 = vst.msk [vmem:[#allocation2 + $0xe8] sm:$0xff] %vm1540_vm11, %v1503_v58  ;;  %v1471_v16 = vpop.permute.xlu0 %1470 }
 0x275   : > { %1554 = vst.msk [vmem:[#allocation2 + $0x68] sm:$0xff] %vm1540_vm11, %v1471_v16 }
 0x277   : > { %v1107_v60 = vpop.permute.xlu1 %1106 }
 0x278   : > { %1172 = vst.msk [vmem:[#allocation2 + $0xf8] sm:$0xff] %vm1140_vm8, %v1107_v60  ;;  %v1075_v45 = vpop.permute.xlu0 %1074 }
 0x279   : > { %1156 = vst.msk [vmem:[#allocation2 + $0x78] sm:$0xff] %vm1140_vm8, %v1075_v45 }
 0x27b   : > { %v1236_v29 = vpop.permute.xlu1 %1235  ;;  %v1602_v6 = vld [vmem:[#allocation2 + $0xe8] sm:$0xff] }
 0x27c   : > { %1302 = vst.msk [vmem:[#allocation2 + $0xf0] sm:$0xff] %vm1271_vm9, %v1236_v29  ;;  %v1204_v57 = vpop.permute.xlu0 %1203  ;;  %v1586_v9 = vld [vmem:[#allocation2 + $0x68] sm:$0xff]  ;;  %2228 = vmatmul.mubr.msk.f32.gmra.mrb[12].mxu1 %vm1617_vm12, %v1602_v6 }
 0x27d   : > { %1286 = vst.msk [vmem:[#allocation2 + $0x70] sm:$0xff] %vm1271_vm9, %v1204_v57  ;;  %2204 = vmatmul.mubr.msk.f32.gmra.mrb[12].mxu0 %vm1617_vm12, %v1586_v9 }
 0x27f   : > { %v1238_v59 = vpop.permute.xlu1 %1237 }
 0x280   : > { %1303 = vst.msk [vmem:[#allocation2 + $0xf8] sm:$0xff] %vm1271_vm9, %v1238_v59  ;;  %v1206_v2 = vpop.permute.xlu0 %1205 }
 0x281   : > { %1287 = vst.msk [vmem:[#allocation2 + $0x78] sm:$0xff] %vm1271_vm9, %v1206_v2 }
 0x283   : > { %v1371_v7 = vpop.permute.xlu1 %1370 }
 0x284   : > { %1437 = vst.msk [vmem:[#allocation2 + $0xf0] sm:$0xff] %vm1406_vm10, %v1371_v7  ;;  %v1339_v47 = vpop.permute.xlu0 %1338 }
 0x285   : > { %1421 = vst.msk [vmem:[#allocation2 + $0x70] sm:$0xff] %vm1406_vm10, %v1339_v47 }
 0x287   : > { %v1373_v8 = vpop.permute.xlu1 %1372  ;;  %v2214_v40 = vpop.f32.mrb[2].mxu1 }
 0x288   : > { %1438 = vst.msk [vmem:[#allocation2 + $0xf8] sm:$0xff] %vm1406_vm10, %v1373_v8  ;;  %v1880_v36 = vadd.f32 %v2214_v40, %v3763_v5  ;;  %v1341_v39 = vpop.permute.xlu0 %1340  ;;  %v2190_v12 = vpop.f32.mrb[2].mxu0 }
 0x289   : > { %1422 = vst.msk [vmem:[#allocation2 + $0x78] sm:$0xff] %vm1406_vm10, %v1341_v39  ;;  %v1800_v37 = vadd.f32 %v2190_v12, %v3763_v5  ;;  %v1794_v21 = vpop.f32.mrb[3].mxu0  ;;  %v1874_v17 = vpop.f32.mrb[3].mxu1 }
 0x28a   : > { %1962 = vst [vmem:[%s3769_s10 + $0x98] sm:$0xff] %v1880_v36  ;;  %v1795_v56 = vadd.f32 %v3763_v5, %v1794_v21  ;;  %v1875_v28 = vadd.f32 %v3763_v5, %v1874_v17 }
 0x28b   : > { %1946 = vst [vmem:[%s3769_s10 + $0x18] sm:$0xff] %v1800_v37  ;;  %v1505_v11 = vpop.permute.xlu1 %1504 }
 0x28c   : > { %1945 = vst [vmem:[%s3769_s10 + $0x10] sm:$0xff] %v1795_v56  ;;  %1961 = vst [vmem:[%s3769_s10 + $0x90] sm:$0xff] %v1875_v28  ;;  %v1473_v3 = vpop.permute.xlu0 %1472 }
 0x28d   : > { %1571 = vst.msk [vmem:[#allocation2 + $0xf0] sm:$0xff] %vm1540_vm11, %v1505_v11  ;;  %1555 = vst.msk [vmem:[#allocation2 + $0x70] sm:$0xff] %vm1540_vm11, %v1473_v3 }
 0x28f   : > { %v1507_v44 = vpop.permute.xlu1 %1506 }
 0x290   : > { %1572 = vst.msk [vmem:[#allocation2 + $0xf8] sm:$0xff] %vm1540_vm11, %v1507_v44  ;;  %v1475_v34 = vpop.permute.xlu0 %1474 }
 0x291   : > { %1556 = vst.msk [vmem:[#allocation2 + $0x78] sm:$0xff] %vm1540_vm11, %v1475_v34 }
 0x294   : > { %v1603_v10 = vld [vmem:[#allocation2 + $0xf0] sm:$0xff] }
 0x295   : > { %v1587_v24 = vld [vmem:[#allocation2 + $0x70] sm:$0xff]  ;;  %2230 = vmatprep.mubr.msk.f32.mxu1 %vm1617_vm12, %v1603_v10 }
 0x296   : > { %2206 = vmatprep.mubr.msk.f32.mxu0 %vm1617_vm12, %v1587_v24 }
 0x297   : > { %v1604_v55 = vld [vmem:[#allocation2 + $0xf8] sm:$0xff] }
 0x298   : > { %v1588_v54 = vld [vmem:[#allocation2 + $0x78] sm:$0xff]  ;;  %2231 = vmatmul.mubr.msk.f32.gmra.mrb[14].mxu1 %vm1617_vm12, %v1604_v55 }
 0x299   : > { %2207 = vmatmul.mubr.msk.f32.gmra.mrb[14].mxu0 %vm1617_vm12, %v1588_v54 }
 0x2af   : > { %v2217_v33 = vpop.f32.mrb[4].mxu1 }
 0x2b0   : > { %v2193_v38 = vpop.f32.mrb[4].mxu0  ;;  %v1890_v43 = vadd.f32 %v2217_v33, %v3763_v5  ;;  %v1884_v25 = vpop.f32.mrb[5].mxu1 }
 0x2b1   : > { %v1810_v27 = vadd.f32 %v2193_v38, %v3763_v5  ;;  %v1804_v22 = vpop.f32.mrb[5].mxu0  ;;  %v1885_v35 = vadd.f32 %v3763_v5, %v1884_v25 }
 0x2b2   : > { %1964 = vst [vmem:[%s3769_s10 + $0xa8] sm:$0xff] %v1890_v43  ;;  %v1805_v32 = vadd.f32 %v3763_v5, %v1804_v22 }
 0x2b3   : > { %1948 = vst [vmem:[%s3769_s10 + $0x28] sm:$0xff] %v1810_v27  ;;  %1963 = vst [vmem:[%s3769_s10 + $0xa0] sm:$0xff] %v1885_v35 }
 0x2b4   : > { %1947 = vst [vmem:[%s3769_s10 + $0x20] sm:$0xff] %v1805_v32 }
 0x2d7   : > { %v2220_v63 = vpop.f32.mrb[6].mxu1 }
 0x2d8   : > { %v2196_v15 = vpop.f32.mrb[6].mxu0  ;;  %v1900_v14 = vadd.f32 %v2220_v63, %v3763_v5  ;;  %v1894_v31 = vpop.f32.mrb[7].mxu1 }
 0x2d9   : > { %v1820_v62 = vadd.f32 %v2196_v15, %v3763_v5  ;;  %v1814_v4 = vpop.f32.mrb[7].mxu0  ;;  %v1895_v23 = vadd.f32 %v3763_v5, %v1894_v31 }
 0x2da   : > { %1966 = vst [vmem:[%s3769_s10 + $0xb8] sm:$0xff] %v1900_v14  ;;  %v1815_v51 = vadd.f32 %v3763_v5, %v1814_v4 }
 0x2db   : > { %1950 = vst [vmem:[%s3769_s10 + $0x38] sm:$0xff] %v1820_v62  ;;  %1965 = vst [vmem:[%s3769_s10 + $0xb0] sm:$0xff] %v1895_v23 }
 0x2dc   : > { %1949 = vst [vmem:[%s3769_s10 + $0x30] sm:$0xff] %v1815_v51 }
 0x2ff   : > { %v2223_v13 = vpop.f32.mrb[8].mxu1 }
 0x300   : > { %v2199_v20 = vpop.f32.mrb[8].mxu0  ;;  %v1910_v19 = vadd.f32 %v2223_v13, %v3763_v5  ;;  %v1904_v50 = vpop.f32.mrb[9].mxu1 }
 0x301   : > { %v1830_v61 = vadd.f32 %v2199_v20, %v3763_v5  ;;  %v1824_v49 = vpop.f32.mrb[9].mxu0  ;;  %v1905_v26 = vadd.f32 %v3763_v5, %v1904_v50 }
 0x302   : > { %1968 = vst [vmem:[%s3769_s10 + $0xc8] sm:$0xff] %v1910_v19  ;;  %v1825_v42 = vadd.f32 %v3763_v5, %v1824_v49 }
 0x303   : > { %1952 = vst [vmem:[%s3769_s10 + $0x48] sm:$0xff] %v1830_v61  ;;  %1967 = vst [vmem:[%s3769_s10 + $0xc0] sm:$0xff] %v1905_v26 }
 0x304   : > { %1951 = vst [vmem:[%s3769_s10 + $0x40] sm:$0xff] %v1825_v42 }
 0x327   : > { %v2226_v18 = vpop.f32.mrb[10].mxu1 }
 0x328   : > { %v2202_v46 = vpop.f32.mrb[10].mxu0  ;;  %v1920_v0 = vadd.f32 %v2226_v18, %v3763_v5  ;;  %v1914_v52 = vpop.f32.mrb[11].mxu1 }
 0x329   : > { %v1840_v41 = vadd.f32 %v2202_v46, %v3763_v5  ;;  %v1834_v1 = vpop.f32.mrb[11].mxu0  ;;  %v1915_v48 = vadd.f32 %v3763_v5, %v1914_v52 }
 0x32a   : > { %1970 = vst [vmem:[%s3769_s10 + $0xd8] sm:$0xff] %v1920_v0  ;;  %v1835_v30 = vadd.f32 %v3763_v5, %v1834_v1 }
 0x32b   : > { %1954 = vst [vmem:[%s3769_s10 + $0x58] sm:$0xff] %v1840_v41  ;;  %1969 = vst [vmem:[%s3769_s10 + $0xd0] sm:$0xff] %v1915_v48 }
 0x32c   : > { %1953 = vst [vmem:[%s3769_s10 + $0x50] sm:$0xff] %v1835_v30 }
 0x34f   : > { %v2229_v53 = vpop.f32.mrb[12].mxu1 }
 0x350   : > { %v2205_v58 = vpop.f32.mrb[12].mxu0  ;;  %v1930_v16 = vadd.f32 %v2229_v53, %v3763_v5  ;;  %v1924_v60 = vpop.f32.mrb[13].mxu1 }
 0x351   : > { %v1850_v45 = vadd.f32 %v2205_v58, %v3763_v5  ;;  %v1844_v29 = vpop.f32.mrb[13].mxu0  ;;  %v1925_v6 = vadd.f32 %v3763_v5, %v1924_v60 }
 0x352   : > { %1972 = vst [vmem:[%s3769_s10 + $0xe8] sm:$0xff] %v1930_v16  ;;  %v1845_v57 = vadd.f32 %v3763_v5, %v1844_v29 }
 0x353   : > { %1956 = vst [vmem:[%s3769_s10 + $0x68] sm:$0xff] %v1850_v45  ;;  %1971 = vst [vmem:[%s3769_s10 + $0xe0] sm:$0xff] %v1925_v6 }
 0x354   : > { %1955 = vst [vmem:[%s3769_s10 + $0x60] sm:$0xff] %v1845_v57 }
 0x36b   : > { %v2232_v9 = vpop.f32.mrb[14].mxu1 }
 0x36c   : > { %v2208_v59 = vpop.f32.mrb[14].mxu0  ;;  %v1940_v2 = vadd.f32 %v2232_v9, %v3763_v5  ;;  %v1934_v7 = vpop.f32.mrb[15].mxu1 }
 0x36d   : > { %v1860_v47 = vadd.f32 %v2208_v59, %v3763_v5  ;;  %v1854_v8 = vpop.f32.mrb[15].mxu0  ;;  %v1935_v40 = vadd.f32 %v3763_v5, %v1934_v7 }
 0x36e   : > { %1974 = vst [vmem:[%s3769_s10 + $0xf8] sm:$0xff] %v1940_v2  ;;  %v1855_v36 = vadd.f32 %v3763_v5, %v1854_v8 }
 0x36f   : > { %1958 = vst [vmem:[%s3769_s10 + $0x78] sm:$0xff] %v1860_v47  ;;  %1973 = vst [vmem:[%s3769_s10 + $0xf0] sm:$0xff] %v1935_v40 }
 0x370   : > { %1957 = vst [vmem:[%s3769_s10 + $0x70] sm:$0xff] %v1855_v36 }
 0x371   : > { %2325 = shalt.err (!%p2322_p5)
}
 0x372   : > { %s2326_s4 = scalar_lea.hbm %s3865_s23, 4096  ;;  %s2330_s7 = scalar_lea.hbm %s3926_s3, 8192 }
 0x373   : > { %p2327_p6 = scmp.ne.s32.totalorder %s3865_s23, %s2326_s4  ;;  %p2331_p10 = scmp.lt.u32.totalorder %s3865_s23, %s3926_s3 }
 0x374   : > { %p2332_p11 = scmp.lt.u32.totalorder %s2330_s7, %s2326_s4  ;;  %p2334_p13 = scmp.lt.u32.totalorder %s2326_s4, %s3865_s23 }
 0x375   : > { %p2328_p7 = pnand %p2327_p6, %p2462_p4 }
 0x376   : > { %p2333_p12 = por %p2332_p11, %p2331_p10 }
 0x377   : > { %p2329_p9 = pneg %p2328_p7 }
 0x378   : > { %p2335_p0 = por %p2334_p13, %p2333_p12 }
 0x37a   : > { %p2336_p1 = pnand %p2335_p0, %p2329_p9 }
 0x37c   : > { %2339 = shalt.err (!%p2336_p1)
}
 0x37d   : > { %s2401_s10 = smov 128  }
 0x37e   : > { %2248 = dma.vmem_to_hbm [thread:$0]  (%p2462_p4), %s3869_s18, 4096, %s3865_s23, %s3876_s15, %s2401_s10, %s2401_s10, %s2393_s5  }
 0x37f PF: > { %p2254_p2 = scmp.ge.s32.totalorder %s2390_s17, 2  ;;  %s2005_s11 = sand.u32 1, %s2370_s12  }
 0x380   : > { %s2006_s19 = scalar_lea.sflag [#allocation4], %s2005_s11 }
 0x381   : > { %p2251_p3 = pnand %p2254_p2, %p2469_p8 }
 0x383   : > { %2365 = dma.done.wait (!%p2251_p3), %s2006_s19, 4096  }
 0x384   : > { %2367 = vsyncadd (!%p2251_p3), %s2006_s19, 4294963200  ;;  %s16_s17 = sadd.s32 1, %s2390_s17   ;;  %s4061_s12 = smov %s2374_s13 }
 0x385   : > { %p13_p5 = scmp.ge.s32.totalorder %s16_s17, 4   ;;  %s4062_s13 = smov %s2378_s14 }
 0x386   : > { %s4063_s14 = smov %s2475_s25  ;;  %s4064_s15 = smov %s2386_s16 }
 0x387   : > { %s4065_s16 = smov %s4067_s20  ;;  %15 = sbr.rel (!%p13_p5) target bundleno = 4 (0x4), region = 77 }
 0x38e   :  { %2011 = vsyncpa [#allocation4], 1 }
 0x38f   :  { %2013 = vsyncpa [#allocation4 + $0x1], 1 }

</bundles_post_ra>
